<compile_context>
chip_gen: v5e
topology: v5e:2x2
jax: 0.10.0
libtpu: 0.0.40
codegen_flags: <defaults>
</compile_context>

<pallas_src>
import functools

import numpy as np
import jax
import jax.numpy as jnp
from jax import lax
from jax.experimental import pallas as pl
from jax.experimental.pallas import tpu as pltpu


# ----------------------------------------------------------------------------
# In-kernel helpers
# ----------------------------------------------------------------------------
def _layernorm(x, gamma, beta, eps=1e-5):
    # PyTorch nn.LayerNorm: biased variance, eps=1e-5.
    mean = jnp.mean(x, axis=-1, keepdims=True)
    var = jnp.mean((x - mean) ** 2, axis=-1, keepdims=True)
    return (x - mean) * lax.rsqrt(var + eps) * gamma + beta


# ----------------------------------------------------------------------------
# Fused kernel: embedding + PE + N encoder layers, whole batch in one shot.
# ----------------------------------------------------------------------------
def fused_encoder_kernel(x_ref, w_emb_ref, add_emb_ref, mask_ref,
                         wqkv_ref, bu_ref, g1_ref, be1_ref,
                         w1_ref, b1_ref, w2_ref, b2_ref, g2_ref, be2_ref,
                         o_ref, *, n_layers, heads, d_model, head_pad):
    D, H, P = d_model, heads, head_pad

    # Embedding: sqrt(d_model) is folded into w_emb; bias*sqrt(d_model) + PE
    # was pre-added into add_emb at pack time.
    y = (jnp.dot(x_ref[...], w_emb_ref[...],
                 preferred_element_type=jnp.float32) + add_emb_ref[...])
    mask = mask_ref[...]                       # (R, R) block-diag additive mask

    for i in range(n_layers):                  # static unroll (N is small)
        # One lane-dense GEMM produces q / k / (v @ Wu) for every head; each
        # head block is zero-padded to a full 128-lane tile so the slices
        # below are tile aligned (no lane relayouts, no concatenation).
        qkv = jnp.dot(y, wqkv_ref[i], preferred_element_type=jnp.float32)
        attn = None
        for h in range(H):                     # static unroll (H is small)
            qh = qkv[:, h * P:(h + 1) * P]
            kh = qkv[:, (H + h) * P:(H + h + 1) * P]
            vuh = qkv[:, (2 * H + h) * P:(2 * H + h + 1) * P]
            # q . k^T over all B*S rows (no materialized transpose); the
            # additive mask kills cross-batch blocks so softmax stays
            # per batch element.  No 1/sqrt(d) scaling — matches the
            # reference PyTorch code.
            s = lax.dot_general(qh, kh, (((1,), (1,)), ((), ())),
                                preferred_element_type=jnp.float32) + mask
            s = s - jnp.max(s, axis=-1, keepdims=True)
            p = jnp.exp(s)
            p = p / jnp.sum(p, axis=-1, keepdims=True)   # exact softmax
            oh = jnp.dot(p, vuh, preferred_element_type=jnp.float32)  # (R, P)
            attn = oh if attn is None else attn + oh
        attn = attn[:, :D] + bu_ref[i]          # padded lanes are exact zeros

        # TODO(synk): nn.Dropout layers are identity here (eval-mode semantics).
        y1 = _layernorm(y + attn, g1_ref[i], be1_ref[i])

        # ---- pointwise feed-forward ----
        h1 = jnp.dot(y1, w1_ref[i], preferred_element_type=jnp.float32) + b1_ref[i]
        h1 = jnp.maximum(h1, 0.0)
        ffn = jnp.dot(h1, w2_ref[i], preferred_element_type=jnp.float32) + b2_ref[i]
        y = _layernorm(y1 + ffn, g2_ref[i], be2_ref[i])

    o_ref[...] = y


# ----------------------------------------------------------------------------
# pallas_call plumbing
# ----------------------------------------------------------------------------
def encoder_forward(x, packed, *, n_layers, heads, d_model, head_pad):
    B, S, inp_dim = x.shape
    R = B * S
    x2d = x.reshape(R, inp_dim)                 # flatten batch into the row axis
    kern = functools.partial(fused_encoder_kernel, n_layers=n_layers,
                             heads=heads, d_model=d_model, head_pad=head_pad)
    n_inputs = 1 + len(packed)
    out2d = pl.pallas_call(
        kern,
        out_shape=jax.ShapeDtypeStruct((R, d_model), jnp.float32),
        # No grid: single kernel invocation; whole arrays resident in VMEM.
        in_specs=[pl.BlockSpec(memory_space=pltpu.MemorySpace.VMEM)
                  for _ in range(n_inputs)],
        out_specs=pl.BlockSpec(memory_space=pltpu.MemorySpace.VMEM),
    )(x2d, *packed)
    return out2d.reshape(B, S, d_model)


# ----------------------------------------------------------------------------
# Parameter construction / packing
# ----------------------------------------------------------------------------
def make_positional_encoding(window, d_model):
    pe = np.zeros((window, d_model), dtype=np.float32)
    for pos in range(window):
        for i in range(0, d_model, 2):
            pe[pos, i] = np.sin(pos / 10000 ** (2 * i / d_model))
        for i in range(1, d_model, 2):
            pe[pos, i] = np.cos(pos / 10000 ** (2 * (i + 1) / d_model))
    return jnp.asarray(pe)


def init_params(key, *, N, pe_window, heads, inp_dim, d_model, dff):
    D, F, H = d_model, dff, heads
    ks = jax.random.split(key, 2 + N)
    norm = lambda k, shape, scale: (scale * jax.random.normal(k, shape)).astype(jnp.float32)

    params = {
        "w_emb": norm(ks[0], (inp_dim, D), 1.0 / np.sqrt(inp_dim)),
        "b_emb": norm(ks[1], (1, D), 0.02),
        "pe": make_positional_encoding(pe_window, D),
        "layers": [],
    }
    for i in range(N):
        lk = jax.random.split(ks[2 + i], 8)
        params["layers"].append({
            "wq": norm(lk[0], (H, D, D), 1.0 / np.sqrt(D)),
            "wk": norm(lk[1], (H, D, D), 1.0 / np.sqrt(D)),
            "wv": norm(lk[2], (H, D, D), 1.0 / np.sqrt(D)),
            "wu": norm(lk[3], (H, D, D), 1.0 / np.sqrt(H * D)),
            "bu": norm(lk[4], (1, D), 0.02),
            "g1": jnp.ones((1, D), jnp.float32),
            "be1": jnp.zeros((1, D), jnp.float32),
            "w1": norm(lk[5], (D, F), 1.0 / np.sqrt(D)),
            "b1": norm(lk[6], (1, F), 0.02),
            "w2": norm(lk[7], (F, D), 1.0 / np.sqrt(F)),
            "b2": jnp.zeros((1, D), jnp.float32),
            "g2": jnp.ones((1, D), jnp.float32),
            "be2": jnp.zeros((1, D), jnp.float32),
        })
    return params


def pack_params(params, *, n_layers, heads, d_model, batch, seq_len, head_pad):
    """One-time offline transform:
       * fold sqrt(d_model) into the embedding weight/bias,
       * pre-add bias + positional encoding into one (B*S, D) additive term,
       * build the block-diagonal attention mask for the flattened batch,
       * pack per-head Wq / Wk / (Wv @ Wu) into one (D, 3*H*P) matrix per
         layer with each head block zero-padded to a 128-lane tile,
       * stack all per-layer tensors along a leading layer axis."""
    D, H, P, N = d_model, heads, head_pad, n_layers
    scale = jnp.sqrt(jnp.float32(D))
    w_emb = params["w_emb"] * scale
    pe = params["pe"][:seq_len]
    add_emb = jnp.tile(pe, (batch, 1)) + params["b_emb"] * scale      # (B*S, D)

    bid = jnp.repeat(jnp.arange(batch), seq_len)
    mask = jnp.where(bid[:, None] == bid[None, :], 0.0, -1e9).astype(jnp.float32)

    def qkv_of(i):
        L = params["layers"][i]
        blk = jnp.zeros((D, 3 * H * P), jnp.float32)
        for h in range(H):
            blk = blk.at[:, h * P: h * P + D].set(L["wq"][h])
            blk = blk.at[:, (H + h) * P:(H + h) * P + D].set(L["wk"][h])
            # Fold the per-head unifyheads matrix into Wv:
            #   (p @ (y @ Wv_h)) @ Wu_h == p @ (y @ (Wv_h @ Wu_h))
            blk = blk.at[:, (2 * H + h) * P:(2 * H + h) * P + D].set(
                L["wv"][h] @ L["wu"][h])
        return blk

    wqkv = jnp.stack([qkv_of(i) for i in range(N)], 0)                # (N, D, 3*H*P)

    def stack(key):
        return jnp.stack([params["layers"][i][key] for i in range(N)], 0)

    return (w_emb, add_emb, mask, wqkv,
            stack("bu"), stack("g1"), stack("be1"),
            stack("w1"), stack("b1"), stack("w2"), stack("b2"),
            stack("g2"), stack("be2"))


# ----------------------------------------------------------------------------
# Pure-JAX reference (same math as the PyTorch module) for a sanity check
# ----------------------------------------------------------------------------
def ref_forward(x, params, *, N, heads, d_model):
    D = d_model
    S = x.shape[1]
    y = x @ params["w_emb"] + params["b_emb"]
    y = y * jnp.sqrt(jnp.float32(D)) + params["pe"][:S]
    for i in range(N):
        p = params["layers"][i]
        q = jnp.einsum("bsd,hde->bhse", y, p["wq"])
        k = jnp.einsum("bsd,hde->bhse", y, p["wk"])
        v = jnp.einsum("bsd,hde->bhse", y, p["wv"])
        s = jnp.einsum("bhqe,bhke->bhqk", q, k)
        s = jax.nn.softmax(s, axis=-1)
        o = jnp.einsum("bhqk,bhke->bhqe", s, v)
        attn = jnp.einsum("bhse,hed->bsd", o, p["wu"]) + p["bu"]
        y1 = _layernorm(y + attn, p["g1"], p["be1"])
        ffn = jax.nn.relu(y1 @ p["w1"] + p["b1"]) @ p["w2"] + p["b2"]
        y = _layernorm(y1 + ffn, p["g2"], p["be2"])
    return y


# ----------------------------------------------------------------------------
if __name__ == "__main__":
    # Encoder(N=2, pe_window=16, heads=2, inp_dim=4, d_model=32, dff=64, dropout=0.1)
    N, PE_WINDOW, HEADS, INP_DIM, D_MODEL, DFF = 2, 16, 2, 4, 32, 64
    B, S = 2, 8
    HEAD_PAD = ((D_MODEL + 127) // 128) * 128   # per-head lane-tile padding

    key = jax.random.PRNGKey(0)
    pkey, xkey = jax.random.split(key)
    params = init_params(pkey, N=N, pe_window=PE_WINDOW, heads=HEADS,
                         inp_dim=INP_DIM, d_model=D_MODEL, dff=DFF)
    x = jax.random.normal(xkey, (B, S, INP_DIM), dtype=jnp.float32)

    packed = pack_params(params, n_layers=N, heads=HEADS, d_model=D_MODEL,
                         batch=B, seq_len=S, head_pad=HEAD_PAD)
    out = encoder_forward(x, packed, n_layers=N, heads=HEADS,
                          d_model=D_MODEL, head_pad=HEAD_PAD)
    out = jax.block_until_ready(out)

    ref = jax.block_until_ready(ref_forward(x, params, N=N, heads=HEADS,
                                            d_model=D_MODEL))
    assert out.shape == (B, S, D_MODEL), out.shape
    np.testing.assert_allclose(np.asarray(out), np.asarray(ref),
                               rtol=2e-3, atol=2e-3)
    print("KERNEL_OK")
</pallas_src>

<mosaic_0001>
module attributes {stable_mosaic.version = 11 : i64} {
  func.func @fused_encoder_kernel(%arg0: memref<16x4xf32, #tpu.memory_space<vmem>>, %arg1: memref<4x32xf32, #tpu.memory_space<vmem>>, %arg2: memref<16x32xf32, #tpu.memory_space<vmem>>, %arg3: memref<16x16xf32, #tpu.memory_space<vmem>>, %arg4: memref<2x32x768xf32, #tpu.memory_space<vmem>>, %arg5: memref<2x1x32xf32, #tpu.memory_space<vmem>>, %arg6: memref<2x1x32xf32, #tpu.memory_space<vmem>>, %arg7: memref<2x1x32xf32, #tpu.memory_space<vmem>>, %arg8: memref<2x32x64xf32, #tpu.memory_space<vmem>>, %arg9: memref<2x1x64xf32, #tpu.memory_space<vmem>>, %arg10: memref<2x64x32xf32, #tpu.memory_space<vmem>>, %arg11: memref<2x1x32xf32, #tpu.memory_space<vmem>>, %arg12: memref<2x1x32xf32, #tpu.memory_space<vmem>>, %arg13: memref<2x1x32xf32, #tpu.memory_space<vmem>>, %arg14: memref<16x32xf32, #tpu.memory_space<vmem>>) attributes {dimension_semantics = [], scalar_prefetch = 0 : i64, scratch_operands = 0 : i64, tpu.core_type = #tpu.core_type<tc>} {
    %c0 = arith.constant 0 : index
    %c0_0 = arith.constant 0 : index
    %0 = vector.load %arg0[%c0, %c0_0] : memref<16x4xf32, #tpu.memory_space<vmem>>, vector<16x4xf32>
    %c0_1 = arith.constant 0 : index
    %c0_2 = arith.constant 0 : index
    %1 = vector.load %arg1[%c0_1, %c0_2] : memref<4x32xf32, #tpu.memory_space<vmem>>, vector<4x32xf32>
    %cst = arith.constant dense<0.000000e+00> : vector<16x32xf32>
    %2 = tpu.matmul %0, %1, %cst {dimension_numbers = #tpu.dot_dimension_numbers<[1], [0], [0], [1], [0, 0, 1, 1], [], []>} : vector<16x4xf32>, vector<4x32xf32>, vector<16x32xf32> -> vector<16x32xf32>
    %c0_3 = arith.constant 0 : index
    %c0_4 = arith.constant 0 : index
    %3 = vector.load %arg2[%c0_3, %c0_4] : memref<16x32xf32, #tpu.memory_space<vmem>>, vector<16x32xf32>
    %4 = arith.addf %2, %3 : vector<16x32xf32>
    %c0_5 = arith.constant 0 : index
    %c0_6 = arith.constant 0 : index
    %5 = vector.load %arg3[%c0_5, %c0_6] : memref<16x16xf32, #tpu.memory_space<vmem>>, vector<16x16xf32>
    %c0_7 = arith.constant 0 : index
    %c0_8 = arith.constant 0 : index
    %c0_9 = arith.constant 0 : index
    %6 = vector.load %arg4[%c0_7, %c0_8, %c0_9] : memref<2x32x768xf32, #tpu.memory_space<vmem>>, vector<1x32x768xf32>
    %7 = vector.shape_cast %6 : vector<1x32x768xf32> to vector<32x768xf32>
    %cst_10 = arith.constant dense<0.000000e+00> : vector<16x768xf32>
    %8 = tpu.matmul %4, %7, %cst_10 {dimension_numbers = #tpu.dot_dimension_numbers<[1], [0], [0], [1], [0, 0, 1, 1], [], []>} : vector<16x32xf32>, vector<32x768xf32>, vector<16x768xf32> -> vector<16x768xf32>
    %9 = vector.extract_strided_slice %8 {offsets = [0, 0], sizes = [16, 128], strides = [1, 1]} : vector<16x768xf32> to vector<16x128xf32>
    %10 = vector.extract_strided_slice %8 {offsets = [0, 256], sizes = [16, 128], strides = [1, 1]} : vector<16x768xf32> to vector<16x128xf32>
    %11 = vector.extract_strided_slice %8 {offsets = [0, 512], sizes = [16, 128], strides = [1, 1]} : vector<16x768xf32> to vector<16x128xf32>
    %cst_11 = arith.constant dense<0.000000e+00> : vector<16x16xf32>
    %12 = tpu.matmul %9, %10, %cst_11 {dimension_numbers = #tpu.dot_dimension_numbers<[1], [1], [0], [0], [0, 0, 1, 0], [], []>} : vector<16x128xf32>, vector<16x128xf32>, vector<16x16xf32> -> vector<16x16xf32>
    %13 = arith.addf %12, %5 : vector<16x16xf32>
    %cst_12 = arith.constant dense<0xFF800000> : vector<16xf32>
    %14 = vector.multi_reduction <maximumf>, %13, %cst_12 [1] : vector<16x16xf32> to vector<16xf32>
    %15 = vector.shape_cast %14 : vector<16xf32> to vector<16x1xf32>
    %16 = vector.broadcast %15 : vector<16x1xf32> to vector<16x16xf32>
    %17 = arith.subf %13, %16 : vector<16x16xf32>
    %18 = math.exp %17 : vector<16x16xf32>
    %cst_13 = arith.constant dense<0.000000e+00> : vector<16xf32>
    %19 = vector.multi_reduction <add>, %18, %cst_13 [1] : vector<16x16xf32> to vector<16xf32>
    %20 = vector.shape_cast %19 : vector<16xf32> to vector<16x1xf32>
    %21 = vector.broadcast %20 : vector<16x1xf32> to vector<16x16xf32>
    %22 = arith.divf %18, %21 : vector<16x16xf32>
    %cst_14 = arith.constant dense<0.000000e+00> : vector<16x128xf32>
    %23 = tpu.matmul %22, %11, %cst_14 {dimension_numbers = #tpu.dot_dimension_numbers<[1], [0], [0], [1], [0, 0, 1, 1], [], []>} : vector<16x16xf32>, vector<16x128xf32>, vector<16x128xf32> -> vector<16x128xf32>
    %24 = vector.extract_strided_slice %8 {offsets = [0, 128], sizes = [16, 128], strides = [1, 1]} : vector<16x768xf32> to vector<16x128xf32>
    %25 = vector.extract_strided_slice %8 {offsets = [0, 384], sizes = [16, 128], strides = [1, 1]} : vector<16x768xf32> to vector<16x128xf32>
    %26 = vector.extract_strided_slice %8 {offsets = [0, 640], sizes = [16, 128], strides = [1, 1]} : vector<16x768xf32> to vector<16x128xf32>
    %cst_15 = arith.constant dense<0.000000e+00> : vector<16x16xf32>
    %27 = tpu.matmul %24, %25, %cst_15 {dimension_numbers = #tpu.dot_dimension_numbers<[1], [1], [0], [0], [0, 0, 1, 0], [], []>} : vector<16x128xf32>, vector<16x128xf32>, vector<16x16xf32> -> vector<16x16xf32>
    %28 = arith.addf %27, %5 : vector<16x16xf32>
    %cst_16 = arith.constant dense<0xFF800000> : vector<16xf32>
    %29 = vector.multi_reduction <maximumf>, %28, %cst_16 [1] : vector<16x16xf32> to vector<16xf32>
    %30 = vector.shape_cast %29 : vector<16xf32> to vector<16x1xf32>
    %31 = vector.broadcast %30 : vector<16x1xf32> to vector<16x16xf32>
    %32 = arith.subf %28, %31 : vector<16x16xf32>
    %33 = math.exp %32 : vector<16x16xf32>
    %cst_17 = arith.constant dense<0.000000e+00> : vector<16xf32>
    %34 = vector.multi_reduction <add>, %33, %cst_17 [1] : vector<16x16xf32> to vector<16xf32>
    %35 = vector.shape_cast %34 : vector<16xf32> to vector<16x1xf32>
    %36 = vector.broadcast %35 : vector<16x1xf32> to vector<16x16xf32>
    %37 = arith.divf %33, %36 : vector<16x16xf32>
    %cst_18 = arith.constant dense<0.000000e+00> : vector<16x128xf32>
    %38 = tpu.matmul %37, %26, %cst_18 {dimension_numbers = #tpu.dot_dimension_numbers<[1], [0], [0], [1], [0, 0, 1, 1], [], []>} : vector<16x16xf32>, vector<16x128xf32>, vector<16x128xf32> -> vector<16x128xf32>
    %39 = arith.addf %23, %38 : vector<16x128xf32>
    %40 = vector.extract_strided_slice %39 {offsets = [0, 0], sizes = [16, 32], strides = [1, 1]} : vector<16x128xf32> to vector<16x32xf32>
    %c0_19 = arith.constant 0 : index
    %c0_20 = arith.constant 0 : index
    %c0_21 = arith.constant 0 : index
    %41 = vector.load %arg5[%c0_19, %c0_20, %c0_21] : memref<2x1x32xf32, #tpu.memory_space<vmem>>, vector<1x1x32xf32>
    %42 = vector.shape_cast %41 : vector<1x1x32xf32> to vector<1x32xf32>
    %43 = vector.broadcast %42 : vector<1x32xf32> to vector<16x32xf32>
    %44 = arith.addf %40, %43 : vector<16x32xf32>
    %45 = arith.addf %4, %44 : vector<16x32xf32>
    %c0_22 = arith.constant 0 : index
    %c0_23 = arith.constant 0 : index
    %c0_24 = arith.constant 0 : index
    %46 = vector.load %arg6[%c0_22, %c0_23, %c0_24] : memref<2x1x32xf32, #tpu.memory_space<vmem>>, vector<1x1x32xf32>
    %47 = vector.shape_cast %46 : vector<1x1x32xf32> to vector<1x32xf32>
    %c0_25 = arith.constant 0 : index
    %c0_26 = arith.constant 0 : index
    %c0_27 = arith.constant 0 : index
    %48 = vector.load %arg7[%c0_25, %c0_26, %c0_27] : memref<2x1x32xf32, #tpu.memory_space<vmem>>, vector<1x1x32xf32>
    %49 = vector.shape_cast %48 : vector<1x1x32xf32> to vector<1x32xf32>
    %cst_28 = arith.constant dense<0.000000e+00> : vector<16xf32>
    %50 = vector.multi_reduction <add>, %45, %cst_28 [1] : vector<16x32xf32> to vector<16xf32>
    %51 = vector.shape_cast %50 : vector<16xf32> to vector<16x1xf32>
    %cst_29 = arith.constant 3.200000e+01 : f32
    %52 = vector.broadcast %cst_29 : f32 to vector<16x1xf32>
    %53 = arith.divf %51, %52 : vector<16x1xf32>
    %54 = vector.broadcast %53 : vector<16x1xf32> to vector<16x32xf32>
    %55 = arith.subf %45, %54 : vector<16x32xf32>
    %56 = arith.mulf %55, %55 : vector<16x32xf32>
    %cst_30 = arith.constant dense<0.000000e+00> : vector<16xf32>
    %57 = vector.multi_reduction <add>, %56, %cst_30 [1] : vector<16x32xf32> to vector<16xf32>
    %58 = vector.shape_cast %57 : vector<16xf32> to vector<16x1xf32>
    %cst_31 = arith.constant 3.200000e+01 : f32
    %59 = vector.broadcast %cst_31 : f32 to vector<16x1xf32>
    %60 = arith.divf %58, %59 : vector<16x1xf32>
    %61 = vector.broadcast %53 : vector<16x1xf32> to vector<16x32xf32>
    %62 = arith.subf %45, %61 : vector<16x32xf32>
    %cst_32 = arith.constant 9.99999974E-6 : f32
    %63 = vector.broadcast %cst_32 : f32 to vector<16x1xf32>
    %64 = arith.addf %60, %63 : vector<16x1xf32>
    %65 = math.rsqrt %64 : vector<16x1xf32>
    %66 = vector.broadcast %65 : vector<16x1xf32> to vector<16x32xf32>
    %67 = arith.mulf %62, %66 : vector<16x32xf32>
    %68 = vector.broadcast %47 : vector<1x32xf32> to vector<16x32xf32>
    %69 = arith.mulf %67, %68 : vector<16x32xf32>
    %70 = vector.broadcast %49 : vector<1x32xf32> to vector<16x32xf32>
    %71 = arith.addf %69, %70 : vector<16x32xf32>
    %c0_33 = arith.constant 0 : index
    %c0_34 = arith.constant 0 : index
    %c0_35 = arith.constant 0 : index
    %72 = vector.load %arg8[%c0_33, %c0_34, %c0_35] : memref<2x32x64xf32, #tpu.memory_space<vmem>>, vector<1x32x64xf32>
    %73 = vector.shape_cast %72 : vector<1x32x64xf32> to vector<32x64xf32>
    %cst_36 = arith.constant dense<0.000000e+00> : vector<16x64xf32>
    %74 = tpu.matmul %71, %73, %cst_36 {dimension_numbers = #tpu.dot_dimension_numbers<[1], [0], [0], [1], [0, 0, 1, 1], [], []>} : vector<16x32xf32>, vector<32x64xf32>, vector<16x64xf32> -> vector<16x64xf32>
    %c0_37 = arith.constant 0 : index
    %c0_38 = arith.constant 0 : index
    %c0_39 = arith.constant 0 : index
    %75 = vector.load %arg9[%c0_37, %c0_38, %c0_39] : memref<2x1x64xf32, #tpu.memory_space<vmem>>, vector<1x1x64xf32>
    %76 = vector.shape_cast %75 : vector<1x1x64xf32> to vector<1x64xf32>
    %77 = vector.broadcast %76 : vector<1x64xf32> to vector<16x64xf32>
    %78 = arith.addf %74, %77 : vector<16x64xf32>
    %cst_40 = arith.constant 0.000000e+00 : f32
    %79 = vector.broadcast %cst_40 : f32 to vector<16x64xf32>
    %80 = arith.maximumf %78, %79 : vector<16x64xf32>
    %c0_41 = arith.constant 0 : index
    %c0_42 = arith.constant 0 : index
    %c0_43 = arith.constant 0 : index
    %81 = vector.load %arg10[%c0_41, %c0_42, %c0_43] : memref<2x64x32xf32, #tpu.memory_space<vmem>>, vector<1x64x32xf32>
    %82 = vector.shape_cast %81 : vector<1x64x32xf32> to vector<64x32xf32>
    %cst_44 = arith.constant dense<0.000000e+00> : vector<16x32xf32>
    %83 = tpu.matmul %80, %82, %cst_44 {dimension_numbers = #tpu.dot_dimension_numbers<[1], [0], [0], [1], [0, 0, 1, 1], [], []>} : vector<16x64xf32>, vector<64x32xf32>, vector<16x32xf32> -> vector<16x32xf32>
    %c0_45 = arith.constant 0 : index
    %c0_46 = arith.constant 0 : index
    %c0_47 = arith.constant 0 : index
    %84 = vector.load %arg11[%c0_45, %c0_46, %c0_47] : memref<2x1x32xf32, #tpu.memory_space<vmem>>, vector<1x1x32xf32>
    %85 = vector.shape_cast %84 : vector<1x1x32xf32> to vector<1x32xf32>
    %86 = vector.broadcast %85 : vector<1x32xf32> to vector<16x32xf32>
    %87 = arith.addf %83, %86 : vector<16x32xf32>
    %88 = arith.addf %71, %87 : vector<16x32xf32>
    %c0_48 = arith.constant 0 : index
    %c0_49 = arith.constant 0 : index
    %c0_50 = arith.constant 0 : index
    %89 = vector.load %arg12[%c0_48, %c0_49, %c0_50] : memref<2x1x32xf32, #tpu.memory_space<vmem>>, vector<1x1x32xf32>
    %90 = vector.shape_cast %89 : vector<1x1x32xf32> to vector<1x32xf32>
    %c0_51 = arith.constant 0 : index
    %c0_52 = arith.constant 0 : index
    %c0_53 = arith.constant 0 : index
    %91 = vector.load %arg13[%c0_51, %c0_52, %c0_53] : memref<2x1x32xf32, #tpu.memory_space<vmem>>, vector<1x1x32xf32>
    %92 = vector.shape_cast %91 : vector<1x1x32xf32> to vector<1x32xf32>
    %cst_54 = arith.constant dense<0.000000e+00> : vector<16xf32>
    %93 = vector.multi_reduction <add>, %88, %cst_54 [1] : vector<16x32xf32> to vector<16xf32>
    %94 = vector.shape_cast %93 : vector<16xf32> to vector<16x1xf32>
    %cst_55 = arith.constant 3.200000e+01 : f32
    %95 = vector.broadcast %cst_55 : f32 to vector<16x1xf32>
    %96 = arith.divf %94, %95 : vector<16x1xf32>
    %97 = vector.broadcast %96 : vector<16x1xf32> to vector<16x32xf32>
    %98 = arith.subf %88, %97 : vector<16x32xf32>
    %99 = arith.mulf %98, %98 : vector<16x32xf32>
    %cst_56 = arith.constant dense<0.000000e+00> : vector<16xf32>
    %100 = vector.multi_reduction <add>, %99, %cst_56 [1] : vector<16x32xf32> to vector<16xf32>
    %101 = vector.shape_cast %100 : vector<16xf32> to vector<16x1xf32>
    %cst_57 = arith.constant 3.200000e+01 : f32
    %102 = vector.broadcast %cst_57 : f32 to vector<16x1xf32>
    %103 = arith.divf %101, %102 : vector<16x1xf32>
    %104 = vector.broadcast %96 : vector<16x1xf32> to vector<16x32xf32>
    %105 = arith.subf %88, %104 : vector<16x32xf32>
    %cst_58 = arith.constant 9.99999974E-6 : f32
    %106 = vector.broadcast %cst_58 : f32 to vector<16x1xf32>
    %107 = arith.addf %103, %106 : vector<16x1xf32>
    %108 = math.rsqrt %107 : vector<16x1xf32>
    %109 = vector.broadcast %108 : vector<16x1xf32> to vector<16x32xf32>
    %110 = arith.mulf %105, %109 : vector<16x32xf32>
    %111 = vector.broadcast %90 : vector<1x32xf32> to vector<16x32xf32>
    %112 = arith.mulf %110, %111 : vector<16x32xf32>
    %113 = vector.broadcast %92 : vector<1x32xf32> to vector<16x32xf32>
    %114 = arith.addf %112, %113 : vector<16x32xf32>
    %c1 = arith.constant 1 : index
    %c0_59 = arith.constant 0 : index
    %c0_60 = arith.constant 0 : index
    %115 = vector.load %arg4[%c1, %c0_59, %c0_60] : memref<2x32x768xf32, #tpu.memory_space<vmem>>, vector<1x32x768xf32>
    %116 = vector.shape_cast %115 : vector<1x32x768xf32> to vector<32x768xf32>
    %cst_61 = arith.constant dense<0.000000e+00> : vector<16x768xf32>
    %117 = tpu.matmul %114, %116, %cst_61 {dimension_numbers = #tpu.dot_dimension_numbers<[1], [0], [0], [1], [0, 0, 1, 1], [], []>} : vector<16x32xf32>, vector<32x768xf32>, vector<16x768xf32> -> vector<16x768xf32>
    %118 = vector.extract_strided_slice %117 {offsets = [0, 0], sizes = [16, 128], strides = [1, 1]} : vector<16x768xf32> to vector<16x128xf32>
    %119 = vector.extract_strided_slice %117 {offsets = [0, 256], sizes = [16, 128], strides = [1, 1]} : vector<16x768xf32> to vector<16x128xf32>
    %120 = vector.extract_strided_slice %117 {offsets = [0, 512], sizes = [16, 128], strides = [1, 1]} : vector<16x768xf32> to vector<16x128xf32>
    %cst_62 = arith.constant dense<0.000000e+00> : vector<16x16xf32>
    %121 = tpu.matmul %118, %119, %cst_62 {dimension_numbers = #tpu.dot_dimension_numbers<[1], [1], [0], [0], [0, 0, 1, 0], [], []>} : vector<16x128xf32>, vector<16x128xf32>, vector<16x16xf32> -> vector<16x16xf32>
    %122 = arith.addf %121, %5 : vector<16x16xf32>
    %cst_63 = arith.constant dense<0xFF800000> : vector<16xf32>
    %123 = vector.multi_reduction <maximumf>, %122, %cst_63 [1] : vector<16x16xf32> to vector<16xf32>
    %124 = vector.shape_cast %123 : vector<16xf32> to vector<16x1xf32>
    %125 = vector.broadcast %124 : vector<16x1xf32> to vector<16x16xf32>
    %126 = arith.subf %122, %125 : vector<16x16xf32>
    %127 = math.exp %126 : vector<16x16xf32>
    %cst_64 = arith.constant dense<0.000000e+00> : vector<16xf32>
    %128 = vector.multi_reduction <add>, %127, %cst_64 [1] : vector<16x16xf32> to vector<16xf32>
    %129 = vector.shape_cast %128 : vector<16xf32> to vector<16x1xf32>
    %130 = vector.broadcast %129 : vector<16x1xf32> to vector<16x16xf32>
    %131 = arith.divf %127, %130 : vector<16x16xf32>
    %cst_65 = arith.constant dense<0.000000e+00> : vector<16x128xf32>
    %132 = tpu.matmul %131, %120, %cst_65 {dimension_numbers = #tpu.dot_dimension_numbers<[1], [0], [0], [1], [0, 0, 1, 1], [], []>} : vector<16x16xf32>, vector<16x128xf32>, vector<16x128xf32> -> vector<16x128xf32>
    %133 = vector.extract_strided_slice %117 {offsets = [0, 128], sizes = [16, 128], strides = [1, 1]} : vector<16x768xf32> to vector<16x128xf32>
    %134 = vector.extract_strided_slice %117 {offsets = [0, 384], sizes = [16, 128], strides = [1, 1]} : vector<16x768xf32> to vector<16x128xf32>
    %135 = vector.extract_strided_slice %117 {offsets = [0, 640], sizes = [16, 128], strides = [1, 1]} : vector<16x768xf32> to vector<16x128xf32>
    %cst_66 = arith.constant dense<0.000000e+00> : vector<16x16xf32>
    %136 = tpu.matmul %133, %134, %cst_66 {dimension_numbers = #tpu.dot_dimension_numbers<[1], [1], [0], [0], [0, 0, 1, 0], [], []>} : vector<16x128xf32>, vector<16x128xf32>, vector<16x16xf32> -> vector<16x16xf32>
    %137 = arith.addf %136, %5 : vector<16x16xf32>
    %cst_67 = arith.constant dense<0xFF800000> : vector<16xf32>
    %138 = vector.multi_reduction <maximumf>, %137, %cst_67 [1] : vector<16x16xf32> to vector<16xf32>
    %139 = vector.shape_cast %138 : vector<16xf32> to vector<16x1xf32>
    %140 = vector.broadcast %139 : vector<16x1xf32> to vector<16x16xf32>
    %141 = arith.subf %137, %140 : vector<16x16xf32>
    %142 = math.exp %141 : vector<16x16xf32>
    %cst_68 = arith.constant dense<0.000000e+00> : vector<16xf32>
    %143 = vector.multi_reduction <add>, %142, %cst_68 [1] : vector<16x16xf32> to vector<16xf32>
    %144 = vector.shape_cast %143 : vector<16xf32> to vector<16x1xf32>
    %145 = vector.broadcast %144 : vector<16x1xf32> to vector<16x16xf32>
    %146 = arith.divf %142, %145 : vector<16x16xf32>
    %cst_69 = arith.constant dense<0.000000e+00> : vector<16x128xf32>
    %147 = tpu.matmul %146, %135, %cst_69 {dimension_numbers = #tpu.dot_dimension_numbers<[1], [0], [0], [1], [0, 0, 1, 1], [], []>} : vector<16x16xf32>, vector<16x128xf32>, vector<16x128xf32> -> vector<16x128xf32>
    %148 = arith.addf %132, %147 : vector<16x128xf32>
    %149 = vector.extract_strided_slice %148 {offsets = [0, 0], sizes = [16, 32], strides = [1, 1]} : vector<16x128xf32> to vector<16x32xf32>
    %c1_70 = arith.constant 1 : index
    %c0_71 = arith.constant 0 : index
    %c0_72 = arith.constant 0 : index
    %150 = vector.load %arg5[%c1_70, %c0_71, %c0_72] : memref<2x1x32xf32, #tpu.memory_space<vmem>>, vector<1x1x32xf32>
    %151 = vector.shape_cast %150 : vector<1x1x32xf32> to vector<1x32xf32>
    %152 = vector.broadcast %151 : vector<1x32xf32> to vector<16x32xf32>
    %153 = arith.addf %149, %152 : vector<16x32xf32>
    %154 = arith.addf %114, %153 : vector<16x32xf32>
    %c1_73 = arith.constant 1 : index
    %c0_74 = arith.constant 0 : index
    %c0_75 = arith.constant 0 : index
    %155 = vector.load %arg6[%c1_73, %c0_74, %c0_75] : memref<2x1x32xf32, #tpu.memory_space<vmem>>, vector<1x1x32xf32>
    %156 = vector.shape_cast %155 : vector<1x1x32xf32> to vector<1x32xf32>
    %c1_76 = arith.constant 1 : index
    %c0_77 = arith.constant 0 : index
    %c0_78 = arith.constant 0 : index
    %157 = vector.load %arg7[%c1_76, %c0_77, %c0_78] : memref<2x1x32xf32, #tpu.memory_space<vmem>>, vector<1x1x32xf32>
    %158 = vector.shape_cast %157 : vector<1x1x32xf32> to vector<1x32xf32>
    %cst_79 = arith.constant dense<0.000000e+00> : vector<16xf32>
    %159 = vector.multi_reduction <add>, %154, %cst_79 [1] : vector<16x32xf32> to vector<16xf32>
    %160 = vector.shape_cast %159 : vector<16xf32> to vector<16x1xf32>
    %cst_80 = arith.constant 3.200000e+01 : f32
    %161 = vector.broadcast %cst_80 : f32 to vector<16x1xf32>
    %162 = arith.divf %160, %161 : vector<16x1xf32>
    %163 = vector.broadcast %162 : vector<16x1xf32> to vector<16x32xf32>
    %164 = arith.subf %154, %163 : vector<16x32xf32>
    %165 = arith.mulf %164, %164 : vector<16x32xf32>
    %cst_81 = arith.constant dense<0.000000e+00> : vector<16xf32>
    %166 = vector.multi_reduction <add>, %165, %cst_81 [1] : vector<16x32xf32> to vector<16xf32>
    %167 = vector.shape_cast %166 : vector<16xf32> to vector<16x1xf32>
    %cst_82 = arith.constant 3.200000e+01 : f32
    %168 = vector.broadcast %cst_82 : f32 to vector<16x1xf32>
    %169 = arith.divf %167, %168 : vector<16x1xf32>
    %170 = vector.broadcast %162 : vector<16x1xf32> to vector<16x32xf32>
    %171 = arith.subf %154, %170 : vector<16x32xf32>
    %cst_83 = arith.constant 9.99999974E-6 : f32
    %172 = vector.broadcast %cst_83 : f32 to vector<16x1xf32>
    %173 = arith.addf %169, %172 : vector<16x1xf32>
    %174 = math.rsqrt %173 : vector<16x1xf32>
    %175 = vector.broadcast %174 : vector<16x1xf32> to vector<16x32xf32>
    %176 = arith.mulf %171, %175 : vector<16x32xf32>
    %177 = vector.broadcast %156 : vector<1x32xf32> to vector<16x32xf32>
    %178 = arith.mulf %176, %177 : vector<16x32xf32>
    %179 = vector.broadcast %158 : vector<1x32xf32> to vector<16x32xf32>
    %180 = arith.addf %178, %179 : vector<16x32xf32>
    %c1_84 = arith.constant 1 : index
    %c0_85 = arith.constant 0 : index
    %c0_86 = arith.constant 0 : index
    %181 = vector.load %arg8[%c1_84, %c0_85, %c0_86] : memref<2x32x64xf32, #tpu.memory_space<vmem>>, vector<1x32x64xf32>
    %182 = vector.shape_cast %181 : vector<1x32x64xf32> to vector<32x64xf32>
    %cst_87 = arith.constant dense<0.000000e+00> : vector<16x64xf32>
    %183 = tpu.matmul %180, %182, %cst_87 {dimension_numbers = #tpu.dot_dimension_numbers<[1], [0], [0], [1], [0, 0, 1, 1], [], []>} : vector<16x32xf32>, vector<32x64xf32>, vector<16x64xf32> -> vector<16x64xf32>
    %c1_88 = arith.constant 1 : index
    %c0_89 = arith.constant 0 : index
    %c0_90 = arith.constant 0 : index
    %184 = vector.load %arg9[%c1_88, %c0_89, %c0_90] : memref<2x1x64xf32, #tpu.memory_space<vmem>>, vector<1x1x64xf32>
    %185 = vector.shape_cast %184 : vector<1x1x64xf32> to vector<1x64xf32>
    %186 = vector.broadcast %185 : vector<1x64xf32> to vector<16x64xf32>
    %187 = arith.addf %183, %186 : vector<16x64xf32>
    %cst_91 = arith.constant 0.000000e+00 : f32
    %188 = vector.broadcast %cst_91 : f32 to vector<16x64xf32>
    %189 = arith.maximumf %187, %188 : vector<16x64xf32>
    %c1_92 = arith.constant 1 : index
    %c0_93 = arith.constant 0 : index
    %c0_94 = arith.constant 0 : index
    %190 = vector.load %arg10[%c1_92, %c0_93, %c0_94] : memref<2x64x32xf32, #tpu.memory_space<vmem>>, vector<1x64x32xf32>
    %191 = vector.shape_cast %190 : vector<1x64x32xf32> to vector<64x32xf32>
    %cst_95 = arith.constant dense<0.000000e+00> : vector<16x32xf32>
    %192 = tpu.matmul %189, %191, %cst_95 {dimension_numbers = #tpu.dot_dimension_numbers<[1], [0], [0], [1], [0, 0, 1, 1], [], []>} : vector<16x64xf32>, vector<64x32xf32>, vector<16x32xf32> -> vector<16x32xf32>
    %c1_96 = arith.constant 1 : index
    %c0_97 = arith.constant 0 : index
    %c0_98 = arith.constant 0 : index
    %193 = vector.load %arg11[%c1_96, %c0_97, %c0_98] : memref<2x1x32xf32, #tpu.memory_space<vmem>>, vector<1x1x32xf32>
    %194 = vector.shape_cast %193 : vector<1x1x32xf32> to vector<1x32xf32>
    %195 = vector.broadcast %194 : vector<1x32xf32> to vector<16x32xf32>
    %196 = arith.addf %192, %195 : vector<16x32xf32>
    %197 = arith.addf %180, %196 : vector<16x32xf32>
    %c1_99 = arith.constant 1 : index
    %c0_100 = arith.constant 0 : index
    %c0_101 = arith.constant 0 : index
    %198 = vector.load %arg12[%c1_99, %c0_100, %c0_101] : memref<2x1x32xf32, #tpu.memory_space<vmem>>, vector<1x1x32xf32>
    %199 = vector.shape_cast %198 : vector<1x1x32xf32> to vector<1x32xf32>
    %c1_102 = arith.constant 1 : index
    %c0_103 = arith.constant 0 : index
    %c0_104 = arith.constant 0 : index
    %200 = vector.load %arg13[%c1_102, %c0_103, %c0_104] : memref<2x1x32xf32, #tpu.memory_space<vmem>>, vector<1x1x32xf32>
    %201 = vector.shape_cast %200 : vector<1x1x32xf32> to vector<1x32xf32>
    %cst_105 = arith.constant dense<0.000000e+00> : vector<16xf32>
    %202 = vector.multi_reduction <add>, %197, %cst_105 [1] : vector<16x32xf32> to vector<16xf32>
    %203 = vector.shape_cast %202 : vector<16xf32> to vector<16x1xf32>
    %cst_106 = arith.constant 3.200000e+01 : f32
    %204 = vector.broadcast %cst_106 : f32 to vector<16x1xf32>
    %205 = arith.divf %203, %204 : vector<16x1xf32>
    %206 = vector.broadcast %205 : vector<16x1xf32> to vector<16x32xf32>
    %207 = arith.subf %197, %206 : vector<16x32xf32>
    %208 = arith.mulf %207, %207 : vector<16x32xf32>
    %cst_107 = arith.constant dense<0.000000e+00> : vector<16xf32>
    %209 = vector.multi_reduction <add>, %208, %cst_107 [1] : vector<16x32xf32> to vector<16xf32>
    %210 = vector.shape_cast %209 : vector<16xf32> to vector<16x1xf32>
    %cst_108 = arith.constant 3.200000e+01 : f32
    %211 = vector.broadcast %cst_108 : f32 to vector<16x1xf32>
    %212 = arith.divf %210, %211 : vector<16x1xf32>
    %213 = vector.broadcast %205 : vector<16x1xf32> to vector<16x32xf32>
    %214 = arith.subf %197, %213 : vector<16x32xf32>
    %cst_109 = arith.constant 9.99999974E-6 : f32
    %215 = vector.broadcast %cst_109 : f32 to vector<16x1xf32>
    %216 = arith.addf %212, %215 : vector<16x1xf32>
    %217 = math.rsqrt %216 : vector<16x1xf32>
    %218 = vector.broadcast %217 : vector<16x1xf32> to vector<16x32xf32>
    %219 = arith.mulf %214, %218 : vector<16x32xf32>
    %220 = vector.broadcast %199 : vector<1x32xf32> to vector<16x32xf32>
    %221 = arith.mulf %219, %220 : vector<16x32xf32>
    %222 = vector.broadcast %201 : vector<1x32xf32> to vector<16x32xf32>
    %223 = arith.addf %221, %222 : vector<16x32xf32>
    %c0_110 = arith.constant 0 : index
    %c0_111 = arith.constant 0 : index
    %224 = vector.load %arg14[%c0_110, %c0_111] : memref<16x32xf32, #tpu.memory_space<vmem>>, vector<16x32xf32>
    tpu.vector_store %arg14[%c0_110, %c0_111], %223 {strides = array<i32>} : memref<16x32xf32, #tpu.memory_space<vmem>>, vector<16x32xf32>,
    return
  }
}

</mosaic_0001>

<bundles_post_ra>
// kernel: tpu_custom_call.1
= control target key start
LH: loop header
LB: loop body
LE: loop exit
PB: predicated region body
PF: predicated region fallthrough
CT: control target
= control target key end

     0   :  { %19 = vsyncpa [#allocation3], 0  ;;  %s1865_s0 = inlined_call_operand.vmem [shape: f32[16,4], index: 0, kind: input, shape index: {}]   ;;  %s1866_s1 = inlined_call_operand.vmem [shape: f32[4,32], index: 1, kind: input, shape index: {}]   ;;  %s1867_s2 = inlined_call_operand.vmem [shape: f32[16,32], index: 2, kind: input, shape index: {}]   ;;  %s1868_s3 = inlined_call_operand.vmem [shape: f32[16,16], index: 3, kind: input, shape index: {}]   ;;  %s1869_s4 = inlined_call_operand.hbm [shape: f32[2,32,768], index: 4, kind: input, shape index: {}]   ;;  %s1870_s5 = inlined_call_operand.vmem [shape: f32[2,1,32], index: 5, kind: input, shape index: {}]   ;;  %s1871_s6 = inlined_call_operand.vmem [shape: f32[2,1,32], index: 6, kind: input, shape index: {}]   ;;  %s1872_s7 = inlined_call_operand.vmem [shape: f32[2,1,32], index: 7, kind: input, shape index: {}]   ;;  %s1873_s8 = inlined_call_operand.vmem [shape: f32[2,32,64], index: 8, kind: input, shape index: {}]   ;;  %s1874_s9 = inlined_call_operand.vmem [shape: f32[2,1,64], index: 9, kind: input, shape index: {}]   ;;  %s1875_s10 = inlined_call_operand.vmem [shape: f32[2,64,32], index: 10, kind: input, shape index: {}]   ;;  %s1876_s11 = inlined_call_operand.vmem [shape: f32[2,1,32], index: 11, kind: input, shape index: {}]   ;;  %s1877_s12 = inlined_call_operand.vmem [shape: f32[2,1,32], index: 12, kind: input, shape index: {}]   ;;  %s1878_s13 = inlined_call_operand.vmem [shape: f32[2,1,32], index: 13, kind: input, shape index: {}]   ;;  %s1879_s14 = inlined_call_operand.hbm [shape: f32[16,32], index: 14, kind: output, shape index: {}]  }
   0x1   :  { %20 = vsyncpa [#allocation4], 0  ;;  %s33_s15 = sshll.u32 %s1869_s4, 4  ;;  %s1472_s16 = smov [#allocation2]   ;;  %s34_s15 = int_to_ptr.hbm [resolvable:$true] %s33_s15 }
   0x2   :  { %s35_s17 = sshll.u32 %s1472_s16, 4  ;;  %s1473_s18 = smov 768   ;;  %s36_s17 = int_to_ptr.vmem [resolvable:$true] %s35_s17 }
   0x3   :  { %s1474_s19 = smov 48  }
   0x4   :  { %41 = dma.hbm_to_vmem [thread:$0]  %s34_s15, 6144, %s36_s17, [#allocation3], %s1473_s18, %s1473_s18, %s1474_s19  }
   0x5   :  { %1468 = dma.done.wait [#allocation3], 6144  }
   0x6   :  { %1469 = vsyncadd [#allocation3], 4294961152  ;;  %vm76_vm0 = vcmask 1043456   ;;  %vm69_vm1 = vcmask 31744   ;;  %v66_v0 = vld [vmem:[%s1866_s1] sm:$0xf] }
   0x7   :  { %v64_v1 = vld [vmem:[%s1865_s0] sm:$0xff]  ;;  %v65_v2 = vld [vmem:[%s1865_s0 + $0x8] sm:$0xff]  ;;  %1286 = vmatpush.msk.msra.mxu0 %vm76_vm0, %v66_v0  ;;  %1348 = vmatpush.msk.msra.mxu1 %vm76_vm0, %v66_v0  ;;  %v123_v3 = vld [vmem:[#allocation2 + $0x90] sm:$0xff]  ;;  %vm129_vm2 = vcmask 261120   ;;  %vm297_vm3 = vcmask 130048   ;;  %s1477_s21 = smov 128  }
   0x8   :  { %v124_v4 = vld [vmem:[#allocation2 + $0x98] sm:$0xff]  ;;  %v125_v5 = vld [vmem:[#allocation2 + $0xa0] sm:$0xff]  ;;  %1287 = vmatmul.msk.f32.vlgmr.msra.gmra.mxu0 %vm69_vm1, %v64_v1  ;;  %1288 = vmatmul.msk.f32.vlgmr.msra.gmra.mxu1 %vm69_vm1, %v65_v2  ;;  %v126_v6 = vld [vmem:[#allocation2 + $0xa8] sm:$0xff]  ;;  %s1478_s22 = smov 8  }
   0x9   :  { %v117_v7 = vld [vmem:[#allocation2 + $0x60] sm:$0xff]  ;;  %v118_v8 = vld [vmem:[#allocation2 + $0x68] sm:$0xff]  ;;  %148 = vmatpush.msrb.mxu1 %v123_v3  ;;  %171 = vmatpush.msra.mxu2 %v124_v4  ;;  %v119_v9 = vld [vmem:[#allocation2 + $0x70] sm:$0xff] }
   0xa   :  { %v120_v10 = vld [vmem:[#allocation2 + $0x78] sm:$0xff]  ;;  %194 = vmatpush.msra.mxu3 %v125_v5  ;;  %217 = vmatpush.msrb.mxu0 %v126_v6  ;;  %v111_v11 = vld [vmem:[#allocation2 + $0x30] sm:$0xff]  ;;  %v113_v13 = vld [vmem:[#allocation2 + $0x40] sm:$0xff] }
   0xb   :  { %149 = vmatpush.msrb.mxu1 %v117_v7  ;;  %172 = vmatpush.msra.mxu2 %v118_v8  ;;  %v112_v12 = vld [vmem:[#allocation2 + $0x38] sm:$0xff]  ;;  %v114_v14 = vld [vmem:[#allocation2 + $0x48] sm:$0xff]  ;;  %v105_v15 = vld [vmem:[#allocation2] sm:$0xff] }
   0xc   :  { %195 = vmatpush.msra.mxu3 %v119_v9  ;;  %218 = vmatpush.msrb.mxu0 %v120_v10  ;;  %v106_v16 = vld [vmem:[#allocation2 + $0x8] sm:$0xff]  ;;  %v107_v17 = vld [vmem:[#allocation2 + $0x10] sm:$0xff]  ;;  %v108_v18 = vld [vmem:[#allocation2 + $0x18] sm:$0xff] }
   0xd   :  { %150 = vmatpush.msrb.mxu1 %v111_v11  ;;  %173 = vmatpush.msra.mxu2 %v112_v12  ;;  %v127_v19 = vld [vmem:[#allocation2 + $0xb0] sm:$0xff]  ;;  %v128_v20 = vld [vmem:[#allocation2 + $0xb8] sm:$0xff]  ;;  %v121_v21 = vld [vmem:[#allocation2 + $0x80] sm:$0xff] }
   0xe   :  { %196 = vmatpush.msra.mxu3 %v113_v13  ;;  %219 = vmatpush.msrb.mxu0 %v114_v14  ;;  %v122_v22 = vld [vmem:[#allocation2 + $0x88] sm:$0xff]  ;;  %v115_v23 = vld [vmem:[#allocation2 + $0x50] sm:$0xff]  ;;  %v116_v24 = vld [vmem:[#allocation2 + $0x58] sm:$0xff] }
   0xf   :  { %151 = vmatpush.msrb.mxu1 %v105_v15  ;;  %174 = vmatpush.msra.mxu2 %v106_v16  ;;  %v109_v25 = vld [vmem:[#allocation2 + $0x20] sm:$0xff]  ;;  %v110_v26 = vld [vmem:[#allocation2 + $0x28] sm:$0xff] }
  0x10   :  { %197 = vmatpush.msra.mxu3 %v107_v17  ;;  %220 = vmatpush.msrb.mxu0 %v108_v18  ;;  %v67_v27 = vld [vmem:[%s1867_s2] sm:$0xff]  ;;  %v68_v30 = vld [vmem:[%s1867_s2 + $0x8] sm:$0xff] }
  0x11   :  { %240 = vmatpush.msra.mxu1 %v127_v19  ;;  %263 = vmatpush.msrb.mxu2 %v128_v20  ;;  %v1603_v45 = vld [vmem:[%s1868_s3] sm:$0xff]  ;;  %v1611_v51 = vld [vmem:[%s1868_s3 + $0x8] sm:$0xff] }
  0x13   :  { %241 = vmatpush.msra.mxu1 %v121_v21  ;;  %264 = vmatpush.msrb.mxu2 %v122_v22 }
  0x15   :  { %242 = vmatpush.msra.mxu1 %v115_v23  ;;  %265 = vmatpush.msrb.mxu2 %v116_v24 }
  0x17   :  { %243 = vmatpush.msra.mxu1 %v109_v25  ;;  %266 = vmatpush.msrb.mxu2 %v110_v26 }
  0x85   :  { %v97_v28 = vpop.f32.mrf.mxu0  ;;  %v100_v31 = vpop.f32.mrf.mxu1 }
  0x86   :  { %v1569_v29 = vadd.f32 %v97_v28, %v67_v27  ;;  %v1582_v32 = vadd.f32 %v100_v31, %v68_v30 }
  0x88   :  { %1289 = vmatmul.msk.f32.vlgmr.msrb.gmra.mxu1 %vm129_vm2, %v1569_v29  ;;  %1291 = vmatmul.msk.f32.vlgmr.msra.gmra.mxu2 %vm129_vm2, %v1569_v29 }
  0x89   :  { %1293 = vmatmul.msk.f32.vlgmr.msra.gmra.mxu3 %vm129_vm2, %v1569_v29  ;;  %1295 = vmatmul.msk.f32.vlgmr.msrb.gmra.mxu0 %vm129_vm2, %v1569_v29 }
  0x90   :  { %1290 = vmatmul.msk.f32.gmra.mxu1 %vm129_vm2, %v1582_v32  ;;  %1292 = vmatmul.msk.f32.gmra.mxu2 %vm129_vm2, %v1582_v32 }
  0x91   :  { %1294 = vmatmul.msk.f32.gmra.mxu3 %vm129_vm2, %v1582_v32  ;;  %1296 = vmatmul.msk.f32.gmra.mxu0 %vm129_vm2, %v1582_v32 }
  0x98   :  { %1297 = vmatmul.msk.f32.vlgmr.msra.gmra.mxu1 %vm129_vm2, %v1569_v29  ;;  %1299 = vmatmul.msk.f32.vlgmr.msrb.gmra.mxu2 %vm129_vm2, %v1569_v29 }
  0xa0   :  { %1298 = vmatmul.msk.f32.gmra.mxu1 %vm129_vm2, %v1582_v32  ;;  %1300 = vmatmul.msk.f32.gmra.mxu2 %vm129_vm2, %v1582_v32 }
 0x105   :  { %v153_v33 = vpop.f32.mrf.mxu1 }
 0x106   :  { %v222_v34 = vpop.f32.mrf.mxu0 }
 0x10b   :  { %v176_v35 = vpop.f32.mrf.mxu2 }
 0x10c   :  { %v199_v36 = vpop.f32.mrf.mxu3 }
 0x10d   :  { %v156_v37 = vpop.f32.mrf.mxu1 }
 0x10e   :  { %v225_v38 = vpop.f32.mrf.mxu0 }
 0x10f   :  { %360 = vmatpush.xpose.msra.mxu0 %v225_v38 }
 0x113   :  { %361 = vmatpush.xpose.msra.mxu0 %v222_v34  ;;  %v179_v39 = vpop.f32.mrf.mxu2 }
 0x114   :  { %v202_v40 = vpop.f32.mrf.mxu3 }
 0x115   :  { %288 = vmatpush.xpose.msrb.mxu3 %v202_v40  ;;  %v245_v41 = vpop.f32.mrf.mxu1 }
 0x116   :  { %362 = vmatmul.f32.vlgmr.msra.gmra.mxu0 %v176_v35 }
 0x119   :  { %289 = vmatpush.xpose.msrb.mxu3 %v199_v36 }
 0x11b   :  { %v268_v42 = vpop.f32.mrf.mxu2 }
 0x11c   :  { %290 = vmatmul.f32.vlgmr.msrb.gmra.mxu3 %v153_v33 }
 0x11d   :  { %v248_v43 = vpop.f32.mrf.mxu1 }
 0x11e   :  { %365 = vmatmul.f32.gmra.mxu0 %v179_v39  ;;  %466 = vmatpush.msra.mxu2 %v248_v43 }
 0x120   :  { %467 = vmatpush.msra.mxu2 %v245_v41 }
 0x123   :  { %v271_v44 = vpop.f32.mrf.mxu2 }
 0x124   :  { %293 = vmatmul.f32.gmra.mxu3 %v156_v37  ;;  %437 = vmatpush.msrb.mxu1 %v271_v44 }
 0x126   :  { %438 = vmatpush.msrb.mxu1 %v268_v42 }
 0x193   :  { %v363_v48 = vpop.f32.mrf.mxu0 }
 0x194   :  { %v364_v50 = vadd.f32 %v363_v48, %v1603_v45 }
 0x196   :  { %v369_v54 = vsel %vm297_vm3, %v364_v50, -inf }
 0x19b   :  { %v366_v56 = vpop.f32.mrf.mxu0 }
 0x19c   :  { %v367_v57 = vadd.f32 %v366_v56, %v1611_v51 }
 0x19e   :  { %v372_v58 = vsel %vm297_vm3, %v367_v57, -inf }
 0x19f   :  { %v291_v46 = vpop.f32.mrf.mxu3 }
 0x1a0   :  { %v292_v47 = vadd.f32 %v291_v46, %v1603_v45 }
 0x1a2   :  { %v298_v49 = vsel %vm297_vm3, %v292_v47, -inf }
 0x1a3   :  { %299 = vmax.xlane.f32.xlu0 %v298_v49 }
 0x1a7   :  { %v294_v52 = vpop.f32.mrf.mxu3 }
 0x1a8   :  { %v295_v53 = vadd.f32 %v294_v52, %v1611_v51 }
 0x1aa   :  { %v301_v55 = vsel %vm297_vm3, %v295_v53, -inf }
 0x1ab   :  { %370 = vmax.xlane.f32.xlu0 %v369_v54  ;;  %302 = vmax.xlane.f32.xlu1 %v301_v55 }
 0x1b3   :  { %373 = vmax.xlane.f32.xlu1 %v372_v58 }
 0x216   :  { %v300_v59 = vpop.xlane.xlu0 %299 }
 0x217   :  { %v304_v60 = vsub.f32 %v292_v47, %v300_v59 }
 0x219   :  { %v306_v61 = vmul.f32 1.442695, %v304_v60 }
 0x21b   :  { %1370 = vpow2.f32 %v306_v61 }
 0x21e   :  { %v371_v62 = vpop.xlane.xlu0 %370  ;;  %v303_v63 = vpop.xlane.xlu1 %302 }
 0x21f   :  { %v375_v0 = vsub.f32 %v364_v50, %v371_v62  ;;  %v305_v1 = vsub.f32 %v295_v53, %v303_v63 }
 0x221   :  { %v1371_v2 = vpop.eup %1370  ;;  %v377_v3 = vmul.f32 1.442695, %v375_v0  ;;  %v308_v4 = vmul.f32 1.442695, %v305_v1 }
 0x222   :  { %v310_v5 = vsel %vm297_vm3, %v1371_v2, 0.0 }
 0x223   :  { %1372 = vpow2.f32 %v377_v3  ;;  %311 = vadd.xlane.f32.xlu2 %v310_v5 }
 0x224   :  { %1374 = vpow2.f32 %v308_v4  ;;  %v1356_v4 = vld [vmem:[%s1870_s5] ss:$0 sm:$0xff] }
 0x226   :  { %v374_v6 = vpop.xlane.xlu1 %373 }
 0x227   :  { %v376_v7 = vsub.f32 %v367_v57, %v374_v6 }
 0x229   :  { %v1619_v8 = vpop.eup %1372  ;;  %v379_v9 = vmul.f32 1.442695, %v376_v7 }
 0x22a   :  { %v1621_v10 = vpop.eup %1374  ;;  %v381_v11 = vsel %vm297_vm3, %v1619_v8, 0.0 }
 0x22b   :  { %1376 = vpow2.f32 %v379_v9  ;;  %382 = vadd.xlane.f32.xlu2 %v381_v11  ;;  %v313_v12 = vsel %vm297_vm3, %v1621_v10, 0.0 }
 0x22c   :  { %314 = vadd.xlane.f32.xlu0 %v313_v12 }
 0x231   :  { %v1627_v13 = vpop.eup %1376 }
 0x232   :  { %v384_v14 = vsel %vm297_vm3, %v1627_v13, 0.0 }
 0x233   :  { %385 = vadd.xlane.f32.xlu1 %v384_v14 }
 0x296   :  { %v312_v15 = vpop.xlane.xlu2 %311 }
 0x297   :  { %1378 = vrcp.f32 %v312_v15  ;;  %v327_v21 = vand.u32 2147483648, %v312_v15  ;;  %v325_v23 = vand.u32 2147483647, %v312_v15  ;;  %vm321_vm5 = vweird.f32 %v312_v15 }
 0x299   :  { %v328_v26 = vor.u32 1.1754944e-38, %v327_v21  ;;  %vm326_vm7 = vcmp.eq.f32.partialorder %v325_v23, 8.507059e+37 }
 0x29d   :  { %v1379_v16 = vpop.eup %1378 }
 0x29e   :  { %v317_v17 = vmul.f32 %v1379_v16, %v312_v15  ;;  %v383_v18 = vpop.xlane.xlu2 %382  ;;  %vm322_vm4 = vweird.f32 %v1379_v16 }
 0x29f   :  { %1380 = vrcp.f32 %v383_v18  ;;  %v315_v19 = vpop.xlane.xlu0 %314  ;;  %vm323_vm6 = vmor %vm321_vm5, %vm322_vm4  ;;  %v398_v37 = vand.u32 2147483648, %v383_v18  ;;  %v396_v40 = vand.u32 2147483647, %v383_v18  ;;  %vm392_vm10 = vweird.f32 %v383_v18 }
 0x2a0   :  { %v318_v20 = vsub.f32 1.0, %v317_v17  ;;  %1382 = vrcp.f32 %v315_v19  ;;  %v342_v41 = vand.u32 2147483648, %v315_v19  ;;  %v340_v43 = vand.u32 2147483647, %v315_v19 }
 0x2a1   :  { %v399_v47 = vor.u32 1.1754944e-38, %v398_v37  ;;  %vm336_vm12 = vweird.f32 %v315_v19  ;;  %vm397_vm13 = vcmp.eq.f32.partialorder %v396_v40, 8.507059e+37  ;;  %v592_v40 = vld [vmem:[%s1875_s10 + $0x38] sm:$0xff] }
 0x2a2   :  { %v319_v22 = vmul.f32 %v1379_v16, %v318_v20  ;;  %v343_v50 = vor.u32 1.1754944e-38, %v342_v41  ;;  %vm341_vm15 = vcmp.eq.f32.partialorder %v340_v43, 8.507059e+37  ;;  %v591_v41 = vld [vmem:[%s1875_s10 + $0x30] sm:$0xff]  ;;  %612 = vmatpush.msrb.mxu0 %v592_v40  ;;  %v706_v40 = vld [vmem:[#allocation2 + $0x160] sm:$0xff] }
 0x2a4   :  { %v320_v24 = vadd.f32 %v1379_v16, %v319_v22  ;;  %613 = vmatpush.msrb.mxu0 %v591_v41  ;;  %v707_v41 = vld [vmem:[#allocation2 + $0x168] sm:$0xff] }
 0x2a5   :  { %v1381_v25 = vpop.eup %1380 }
 0x2a6   :  { %v1383_v27 = vpop.eup %1382  ;;  %v324_v28 = vsel %vm323_vm6, %v1379_v16, %v320_v24  ;;  %v388_v30 = vmul.f32 %v1381_v25, %v383_v18  ;;  %v386_v31 = vpop.xlane.xlu1 %385  ;;  %vm393_vm8 = vweird.f32 %v1381_v25  ;;  %v1475_v16 = vmov 32.0  }
 0x2a7   :  { %v329_v33 = vsel %vm326_vm7, %v328_v26, %v324_v28  ;;  %v332_v34 = vmul.f32 %v1383_v27, %v315_v19  ;;  %1384 = vrcp.f32 %v386_v31  ;;  %vm337_vm9 = vweird.f32 %v1383_v27  ;;  %vm394_vm11 = vmor %vm392_vm10, %vm393_vm8 }
 0x2a8   :  { %v389_v35 = vsub.f32 1.0, %v388_v30  ;;  %v330_v36 = vmul.f32 %v1371_v2, %v329_v33  ;;  %vm338_vm14 = vmor %vm336_vm12, %vm337_vm9  ;;  %v413_v58 = vand.u32 2147483648, %v386_v31  ;;  %v411_v61 = vand.u32 2147483647, %v386_v31  ;;  %v549_v33 = vld [vmem:[%s1873_s8 + $0x18] sm:$0xff] }
 0x2a9   :  { %v333_v38 = vsub.f32 1.0, %v332_v34  ;;  %vm407_vm1 = vweird.f32 %v386_v31  ;;  %1386 = vrcp.f32 %v1475_v16  ;;  %572 = vmatpush.msra.mxu3 %v549_v33  ;;  %v548_v34 = vld [vmem:[%s1873_s8 + $0x10] sm:$0xff] }
 0x2aa   :  { %v390_v39 = vmul.f32 %v1381_v25, %v389_v35  ;;  %1303 = vmatmul.msk.f32.vlgmr.msra.gmra.mxu2 %vm297_vm3, %v330_v36  ;;  %v414_v63 = vor.u32 1.1754944e-38, %v413_v58  ;;  %vm412_vm5 = vcmp.eq.f32.partialorder %v411_v61, 8.507059e+37  ;;  %v547_v35 = vld [vmem:[%s1873_s8 + $0x8] sm:$0xff]  ;;  %v546_v36 = vld [vmem:[%s1873_s8] sm:$0xff] }
 0x2ab   :  { %v334_v42 = vmul.f32 %v1383_v27, %v333_v38  ;;  %573 = vmatpush.msra.mxu3 %v548_v34  ;;  %v1357_v58 = vld [vmem:[%s1871_s6] ss:$0 sm:$0xff] }
 0x2ac   :  { %v391_v44 = vadd.f32 %v1381_v25, %v390_v39 }
 0x2ad   :  { %v1385_v46 = vpop.eup %1384  ;;  %v335_v48 = vadd.f32 %v1383_v27, %v334_v42  ;;  %574 = vmatpush.msra.mxu3 %v547_v35  ;;  %v590_v42 = vld [vmem:[%s1875_s10 + $0x28] sm:$0xff] }
 0x2ae   :  { %v395_v49 = vsel %vm394_vm11, %v1381_v25, %v391_v44  ;;  %v403_v52 = vmul.f32 %v1385_v46, %v386_v31  ;;  %vm408_vm0 = vweird.f32 %v1385_v46  ;;  %614 = vmatpush.msrb.mxu0 %v590_v42  ;;  %v698_v42 = vld [vmem:[#allocation2 + $0x120] sm:$0xff] }
 0x2af   :  { %v400_v53 = vsel %vm397_vm13, %v399_v47, %v395_v49  ;;  %v339_v54 = vsel %vm338_vm14, %v1383_v27, %v335_v48  ;;  %vm409_vm4 = vmor %vm407_vm1, %vm408_vm0  ;;  %v1387_v17 = vpop.eup %1386  ;;  %575 = vmatpush.msra.mxu3 %v546_v36  ;;  %v588_v49 = vld [vmem:[%s1875_s10 + $0x18] sm:$0xff]  ;;  %vm597_vm13 = vcmask 523264  }
 0x2b0   :  { %v404_v55 = vsub.f32 1.0, %v403_v52  ;;  %v401_v56 = vmul.f32 %v1619_v8, %v400_v53  ;;  %v344_v57 = vsel %vm341_vm15, %v343_v50, %v339_v54  ;;  %v492_v18 = vmul.f32 32.0, %v1387_v17 }
 0x2b1   :  { %v345_v59 = vmul.f32 %v1621_v10, %v344_v57  ;;  %vm496_vm6 = vweird.f32 %v1387_v17  ;;  %774 = vmatpush.msrb.mxu3 %v706_v40 }
 0x2b2   :  { %v405_v60 = vmul.f32 %v1385_v46, %v404_v55  ;;  %1301 = vmatmul.msk.f32.vlgmr.msrb.gmra.mxu1 %vm297_vm3, %v401_v56  ;;  %v493_v19 = vsub.f32 1.0, %v492_v18  ;;  %v1360_v18 = vld [vmem:[%s1876_s11] ss:$0 sm:$0xff] }
 0x2b3   :  { %1304 = vmatmul.msk.f32.gmra.mxu2 %vm297_vm3, %v345_v59 }
 0x2b4   :  { %v406_v62 = vadd.f32 %v1385_v46, %v405_v60  ;;  %v494_v20 = vmul.f32 %v1387_v17, %v493_v19 }
 0x2b6   :  { %v410_v0 = vsel %vm409_vm4, %v1385_v46, %v406_v62  ;;  %v495_v21 = vadd.f32 %v1387_v17, %v494_v20  ;;  %v589_v46 = vld [vmem:[%s1875_s10 + $0x20] sm:$0xff] }
 0x2b7   :  { %v415_v1 = vsel %vm412_vm5, %v414_v63, %v410_v0  ;;  %615 = vmatpush.msrb.mxu0 %v589_v46  ;;  %v1358_v62 = vld [vmem:[%s1872_s7] ss:$0 sm:$0xff]  ;;  %v701_v46 = vld [vmem:[#allocation2 + $0x138] sm:$0xff] }
 0x2b8   :  { %v416_v2 = vmul.f32 %v1627_v13, %v415_v1 }
 0x2b9   :  { %616 = vmatpush.msrb.mxu0 %v588_v49  ;;  %v694_v49 = vld [vmem:[#allocation2 + $0x100] sm:$0xff] }
 0x2ba   :  { %1302 = vmatmul.msk.f32.gmra.mxu1 %vm297_vm3, %v416_v2 }
 0x32d   :  { %v469_v3 = vpop.f32.mrf.mxu2 }
 0x32f   :  { %v440_v5 = vpop.f32.mrf.mxu1 }
 0x330   :  { %v470_v6 = vadd.f32 %v469_v3, %v440_v5 }
 0x332   :  { %v479_v7 = vadd.f32 %v1356_v4, %v470_v6 }
 0x334   :  { %v481_v8 = vadd.f32 %v479_v7, %v1569_v29  ;;  %v1645_v29 = vsel %vm496_vm6, %v1387_v17, %v495_v21 }
 0x336   :  { %v485_v9 = vsel %vm129_vm2, %v481_v8, 0.0  ;;  %v472_v10 = vpop.f32.mrf.mxu2 }
 0x337   :  { %486 = vadd.xlane.f32.xlu2 %v485_v9  ;;  %v443_v11 = vpop.f32.mrf.mxu1  ;;  %v586_v9 = vld [vmem:[%s1875_s10 + $0x8] sm:$0xff] }
 0x338   :  { %v473_v12 = vadd.f32 %v472_v10, %v443_v11  ;;  %v585_v10 = vld [vmem:[%s1875_s10] sm:$0xff] }
 0x339   :  { %v1359_v11 = vld [vmem:[%s1874_s9] ss:$0 sm:$0xff] }
 0x33a   :  { %v480_v14 = vadd.f32 %v1356_v4, %v473_v12 }
 0x33c   :  { %v482_v13 = vadd.f32 %v480_v14, %v1582_v32 }
 0x33e   :  { %v488_v15 = vsel %vm129_vm2, %v482_v13, 0.0 }
 0x33f   :  { %489 = vadd.xlane.f32.xlu0 %v488_v15 }
 0x3aa   :  { %v487_v22 = vpop.xlane.xlu2 %486 }
 0x3ab   :  { %v498_v23 = vmul.f32 %v1645_v29, %v487_v22 }
 0x3ad   :  { %v500_v24 = vsub.f32 %v481_v8, %v498_v23  ;;  %v587_v8 = vld [vmem:[%s1875_s10 + $0x10] sm:$0xff] }
 0x3ae   :  { %617 = vmatpush.msrb.mxu0 %v587_v8 }
 0x3af   :  { %v502_v25 = vmul.f32 %v500_v24, %v500_v24 }
 0x3b0   :  { %618 = vmatpush.msrb.mxu0 %v586_v9 }
 0x3b1   :  { %v504_v32 = vsel %vm129_vm2, %v502_v25, 0.0 }
 0x3b2   :  { %505 = vadd.xlane.f32.xlu1 %v504_v32  ;;  %v490_v26 = vpop.xlane.xlu0 %489  ;;  %619 = vmatpush.msrb.mxu0 %v585_v10 }
 0x3b3   :  { %v499_v27 = vmul.f32 %v1645_v29, %v490_v26 }
 0x3b4   :  { %797 = vmatpush.msra.mxu0 %v707_v41 }
 0x3b5   :  { %v501_v28 = vsub.f32 %v482_v13, %v499_v27 }
 0x3b6   :  { %798 = vmatpush.msra.mxu0 %v701_v46 }
 0x3b7   :  { %v503_v30 = vmul.f32 %v501_v28, %v501_v28 }
 0x3b9   :  { %v507_v31 = vsel %vm129_vm2, %v503_v30, 0.0 }
 0x3ba   :  { %508 = vadd.xlane.f32.xlu2 %v507_v31 }
 0x425   :  { %v506_v37 = vpop.xlane.xlu1 %505 }
 0x426   :  { %v510_v38 = vmul.f32 %v506_v37, %v1645_v29 }
 0x428   :  { %v512_v39 = vadd.f32 1e-05, %v510_v38  ;;  %v704_v38 = vld [vmem:[#allocation2 + $0x150] sm:$0xff] }
 0x429   :  { %728 = vmatpush.msra.mxu1 %v704_v38 }
 0x42a   :  { %1388 = vrsqrt.f32 %v512_v39  ;;  %vm520_vm8 = vweird.f32 %v512_v39 }
 0x42b   :  { %729 = vmatpush.msra.mxu1 %v698_v42 }
 0x42d   :  { %v509_v43 = vpop.xlane.xlu2 %508 }
 0x42e   :  { %v511_v44 = vmul.f32 %v509_v43, %v1645_v29  ;;  %v699_v43 = vld [vmem:[#allocation2 + $0x128] sm:$0xff] }
 0x430   :  { %v1389_v47 = vpop.eup %1388  ;;  %v513_v48 = vadd.f32 1e-05, %v511_v44  ;;  %v700_v44 = vld [vmem:[#allocation2 + $0x130] sm:$0xff] }
 0x431   :  { %v515_v50 = vmul.f32 %v1389_v47, %v512_v39  ;;  %vm521_vm7 = vweird.f32 %v1389_v47  ;;  %v705_v39 = vld [vmem:[#allocation2 + $0x158] sm:$0xff]  ;;  %775 = vmatpush.msrb.mxu3 %v700_v44 }
 0x432   :  { %1390 = vrsqrt.f32 %v513_v48  ;;  %vm522_vm9 = vmor %vm520_vm8, %vm521_vm7  ;;  %vm530_vm11 = vweird.f32 %v513_v48  ;;  %751 = vmatpush.msrb.mxu2 %v705_v39 }
 0x433   :  { %v516_v52 = vmul.f32 %v1389_v47, %v515_v50  ;;  %v695_v50 = vld [vmem:[#allocation2 + $0x108] sm:$0xff]  ;;  %776 = vmatpush.msrb.mxu3 %v694_v49 }
 0x434   :  { %752 = vmatpush.msrb.mxu2 %v699_v43  ;;  %799 = vmatpush.msra.mxu0 %v695_v50 }
 0x435   :  { %v517_v53 = vmul.f32 0.5, %v516_v52  ;;  %v686_v52 = vld [vmem:[#allocation2 + $0xc0] sm:$0xff] }
 0x437   :  { %v518_v54 = vsub.f32 1.5, %v517_v53  ;;  %v687_v53 = vld [vmem:[#allocation2 + $0xc8] sm:$0xff] }
 0x438   :  { %v1391_v55 = vpop.eup %1390 }
 0x439   :  { %v519_v56 = vmul.f32 %v1389_v47, %v518_v54  ;;  %v525_v57 = vmul.f32 %v1391_v55, %v513_v48  ;;  %vm531_vm10 = vweird.f32 %v1391_v55  ;;  %v693_v48 = vld [vmem:[#allocation2 + $0xf8] sm:$0xff]  ;;  %v688_v54 = vld [vmem:[#allocation2 + $0xd0] sm:$0xff] }
 0x43a   :  { %vm532_vm12 = vmor %vm530_vm11, %vm531_vm10  ;;  %753 = vmatpush.msrb.mxu2 %v693_v48  ;;  %777 = vmatpush.msrb.mxu3 %v688_v54 }
 0x43b   :  { %v523_v59 = vsel %vm522_vm9, %v1389_v47, %v519_v56  ;;  %v526_v60 = vmul.f32 %v1391_v55, %v525_v57  ;;  %v692_v47 = vld [vmem:[#allocation2 + $0xf0] sm:$0xff] }
 0x43c   :  { %v534_v61 = vmul.f32 %v523_v59, %v500_v24  ;;  %730 = vmatpush.msra.mxu1 %v692_v47  ;;  %754 = vmatpush.msrb.mxu2 %v687_v53  ;;  %v708_v59 = vld [vmem:[#allocation2 + $0x170] sm:$0xff] }
 0x43d   :  { %v527_v63 = vmul.f32 0.5, %v526_v60  ;;  %v709_v60 = vld [vmem:[#allocation2 + $0x178] sm:$0xff] }
 0x43e   :  { %v539_v0 = vmul.f32 %v1357_v58, %v534_v61  ;;  %731 = vmatpush.msra.mxu1 %v686_v52  ;;  %v702_v61 = vld [vmem:[#allocation2 + $0x140] sm:$0xff]  ;;  %843 = vmatpush.msra.mxu2 %v709_v60 }
 0x43f   :  { %v528_v1 = vsub.f32 1.5, %v527_v63 }
 0x440   :  { %v544_v2 = vadd.f32 %v1358_v62, %v539_v0  ;;  %820 = vmatpush.msrb.mxu1 %v708_v59  ;;  %v696_v0 = vld [vmem:[#allocation2 + $0x110] sm:$0xff] }
 0x441   :  { %v529_v3 = vmul.f32 %v1391_v55, %v528_v1  ;;  %v697_v1 = vld [vmem:[#allocation2 + $0x118] sm:$0xff] }
 0x442   :  { %1305 = vmatmul.msk.f32.vlgmr.msra.gmra.mxu3 %vm129_vm2, %v544_v2  ;;  %821 = vmatpush.msrb.mxu1 %v702_v61 }
 0x443   :  { %v533_v4 = vsel %vm532_vm12, %v1391_v55, %v529_v3  ;;  %v689_v55 = vld [vmem:[#allocation2 + $0xd8] sm:$0xff]  ;;  %v690_v3 = vld [vmem:[#allocation2 + $0xe0] sm:$0xff] }
 0x444   :  { %v535_v5 = vmul.f32 %v533_v4, %v501_v28  ;;  %800 = vmatpush.msra.mxu0 %v689_v55  ;;  %v691_v4 = vld [vmem:[#allocation2 + $0xe8] sm:$0xff]  ;;  %822 = vmatpush.msrb.mxu1 %v696_v0 }
 0x446   :  { %v540_v6 = vmul.f32 %v1357_v58, %v535_v5  ;;  %823 = vmatpush.msrb.mxu1 %v690_v3 }
 0x448   :  { %v545_v7 = vadd.f32 %v1358_v62, %v540_v6  ;;  %v703_v62 = vld [vmem:[#allocation2 + $0x148] sm:$0xff] }
 0x449   :  { %844 = vmatpush.msra.mxu2 %v703_v62 }
 0x44a   :  { %1306 = vmatmul.msk.f32.gmra.mxu3 %vm129_vm2, %v545_v7 }
 0x44b   :  { %845 = vmatpush.msra.mxu2 %v697_v1 }
 0x44d   :  { %846 = vmatpush.msra.mxu2 %v691_v4 }
 0x4c5   :  { %v577_v12 = vpop.f32.mrf.mxu3 }
 0x4c6   :  { %v578_v14 = vadd.f32 %v1359_v11, %v577_v12 }
 0x4c8   :  { %v583_v13 = vmax.f32 %v578_v14, 0.0 }
 0x4ca   :  { %1307 = vmatmul.msk.f32.vlgmr.msrb.gmra.mxu0 %vm597_vm13, %v583_v13  ;;  %v1361_v13 = vld [vmem:[%s1877_s12] ss:$0 sm:$0xff] }
 0x4cd   :  { %v580_v15 = vpop.f32.mrf.mxu3 }
 0x4ce   :  { %v581_v16 = vadd.f32 %v1359_v11, %v580_v15 }
 0x4d0   :  { %v584_v17 = vmax.f32 %v581_v16, 0.0 }
 0x4d2   :  { %1308 = vmatmul.msk.f32.gmra.mxu0 %vm597_vm13, %v584_v17  ;;  %v1362_v17 = vld [vmem:[%s1878_s13] ss:$0 sm:$0xff] }
 0x547   :  { %v621_v19 = vpop.f32.mrf.mxu0 }
 0x548   :  { %v622_v20 = vadd.f32 %v1360_v18, %v621_v19 }
 0x54a   :  { %v627_v21 = vadd.f32 %v622_v20, %v544_v2 }
 0x54c   :  { %v631_v22 = vsel %vm129_vm2, %v627_v21, 0.0 }
 0x54d   :  { %632 = vadd.xlane.f32.xlu0 %v631_v22 }
 0x54f   :  { %v624_v23 = vpop.f32.mrf.mxu0 }
 0x550   :  { %v625_v24 = vadd.f32 %v1360_v18, %v624_v23 }
 0x552   :  { %v628_v25 = vadd.f32 %v625_v24, %v545_v7 }
 0x554   :  { %v634_v32 = vsel %vm129_vm2, %v628_v25, 0.0 }
 0x555   :  { %635 = vadd.xlane.f32.xlu1 %v634_v32 }
 0x5c0   :  { %v633_v26 = vpop.xlane.xlu0 %632 }
 0x5c1   :  { %v637_v27 = vmul.f32 %v633_v26, %v1645_v29 }
 0x5c3   :  { %v1708_v28 = vsub.f32 %v627_v21, %v637_v27 }
 0x5c5   :  { %v641_v30 = vmul.f32 %v1708_v28, %v1708_v28 }
 0x5c7   :  { %v643_v31 = vsel %vm129_vm2, %v641_v30, 0.0 }
 0x5c8   :  { %v636_v33 = vpop.xlane.xlu1 %635  ;;  %644 = vadd.xlane.f32.xlu2 %v643_v31 }
 0x5c9   :  { %v638_v34 = vmul.f32 %v636_v33, %v1645_v29 }
 0x5cb   :  { %v1714_v35 = vsub.f32 %v628_v25, %v638_v34 }
 0x5cd   :  { %v642_v36 = vmul.f32 %v1714_v35, %v1714_v35 }
 0x5cf   :  { %v646_v37 = vsel %vm129_vm2, %v642_v36, 0.0 }
 0x5d0   :  { %647 = vadd.xlane.f32.xlu0 %v646_v37 }
 0x63b   :  { %v645_v56 = vpop.xlane.xlu2 %644 }
 0x63c   :  { %v649_v57 = vmul.f32 %v645_v56, %v1645_v29 }
 0x63e   :  { %v651_v58 = vadd.f32 1e-05, %v649_v57 }
 0x640   :  { %1392 = vrsqrt.f32 %v651_v58  ;;  %vm659_vm15 = vweird.f32 %v651_v58 }
 0x643   :  { %v648_v63 = vpop.xlane.xlu0 %647 }
 0x644   :  { %v650_v2 = vmul.f32 %v648_v63, %v1645_v29 }
 0x646   :  { %v1393_v5 = vpop.eup %1392  ;;  %v652_v6 = vadd.f32 1e-05, %v650_v2 }
 0x647   :  { %v654_v7 = vmul.f32 %v1393_v5, %v651_v58  ;;  %vm660_vm14 = vweird.f32 %v1393_v5 }
 0x648   :  { %1394 = vrsqrt.f32 %v652_v6  ;;  %vm661_vm0 = vmor %vm659_vm15, %vm660_vm14  ;;  %vm669_vm4 = vweird.f32 %v652_v6 }
 0x649   :  { %v655_v8 = vmul.f32 %v1393_v5, %v654_v7 }
 0x64b   :  { %v656_v9 = vmul.f32 0.5, %v655_v8 }
 0x64d   :  { %v657_v10 = vsub.f32 1.5, %v656_v9 }
 0x64e   :  { %v1395_v11 = vpop.eup %1394 }
 0x64f   :  { %v658_v12 = vmul.f32 %v1393_v5, %v657_v10  ;;  %v664_v14 = vmul.f32 %v1395_v11, %v652_v6  ;;  %vm670_vm1 = vweird.f32 %v1395_v11 }
 0x650   :  { %vm671_vm5 = vmor %vm669_vm4, %vm670_vm1 }
 0x651   :  { %v662_v15 = vsel %vm661_vm0, %v1393_v5, %v658_v12  ;;  %v665_v16 = vmul.f32 %v1395_v11, %v664_v14 }
 0x652   :  { %v673_v18 = vmul.f32 %v662_v15, %v1708_v28 }
 0x653   :  { %v666_v19 = vmul.f32 0.5, %v665_v16 }
 0x654   :  { %v678_v20 = vmul.f32 %v1361_v13, %v673_v18 }
 0x655   :  { %v667_v21 = vsub.f32 1.5, %v666_v19 }
 0x656   :  { %v1728_v22 = vadd.f32 %v1362_v17, %v678_v20 }
 0x657   :  { %v668_v23 = vmul.f32 %v1395_v11, %v667_v21 }
 0x658   :  { %1309 = vmatmul.msk.f32.vlgmr.msra.gmra.mxu1 %vm129_vm2, %v1728_v22  ;;  %1311 = vmatmul.msk.f32.vlgmr.msrb.gmra.mxu2 %vm129_vm2, %v1728_v22 }
 0x659   :  { %v672_v24 = vsel %vm671_vm5, %v1395_v11, %v668_v23  ;;  %1313 = vmatmul.msk.f32.vlgmr.msrb.gmra.mxu3 %vm129_vm2, %v1728_v22  ;;  %1315 = vmatmul.msk.f32.vlgmr.msra.gmra.mxu0 %vm129_vm2, %v1728_v22 }
 0x65a   :  { %v674_v25 = vmul.f32 %v672_v24, %v1714_v35 }
 0x65c   :  { %v679_v32 = vmul.f32 %v1361_v13, %v674_v25 }
 0x65e   :  { %v1739_v26 = vadd.f32 %v1362_v17, %v679_v32 }
 0x660   :  { %1310 = vmatmul.msk.f32.gmra.mxu1 %vm129_vm2, %v1739_v26  ;;  %1312 = vmatmul.msk.f32.gmra.mxu2 %vm129_vm2, %v1739_v26 }
 0x661   :  { %1314 = vmatmul.msk.f32.gmra.mxu3 %vm129_vm2, %v1739_v26  ;;  %1316 = vmatmul.msk.f32.gmra.mxu0 %vm129_vm2, %v1739_v26 }
 0x668   :  { %1317 = vmatmul.msk.f32.vlgmr.msrb.gmra.mxu1 %vm129_vm2, %v1728_v22  ;;  %1319 = vmatmul.msk.f32.vlgmr.msra.gmra.mxu2 %vm129_vm2, %v1728_v22 }
 0x670   :  { %1318 = vmatmul.msk.f32.gmra.mxu1 %vm129_vm2, %v1739_v26  ;;  %1320 = vmatmul.msk.f32.gmra.mxu2 %vm129_vm2, %v1739_v26 }
 0x6d5   :  { %v733_v27 = vpop.f32.mrf.mxu1 }
 0x6d6   :  { %v802_v28 = vpop.f32.mrf.mxu0 }
 0x6db   :  { %v756_v30 = vpop.f32.mrf.mxu2 }
 0x6dc   :  { %v779_v31 = vpop.f32.mrf.mxu3 }
 0x6dd   :  { %v736_v33 = vpop.f32.mrf.mxu1 }
 0x6de   :  { %v805_v34 = vpop.f32.mrf.mxu0 }
 0x6df   :  { %939 = vmatpush.xpose.msrb.mxu0 %v805_v34 }
 0x6e3   :  { %940 = vmatpush.xpose.msrb.mxu0 %v802_v28  ;;  %v759_v35 = vpop.f32.mrf.mxu2 }
 0x6e4   :  { %v782_v36 = vpop.f32.mrf.mxu3 }
 0x6e5   :  { %868 = vmatpush.xpose.msra.mxu3 %v782_v36  ;;  %v825_v37 = vpop.f32.mrf.mxu1 }
 0x6e6   :  { %941 = vmatmul.f32.vlgmr.msrb.gmra.mxu0 %v756_v30 }
 0x6e9   :  { %869 = vmatpush.xpose.msra.mxu3 %v779_v31 }
 0x6eb   :  { %v848_v38 = vpop.f32.mrf.mxu2 }
 0x6ec   :  { %870 = vmatmul.f32.vlgmr.msra.gmra.mxu3 %v733_v27 }
 0x6ed   :  { %v828_v39 = vpop.f32.mrf.mxu1 }
 0x6ee   :  { %944 = vmatmul.f32.gmra.mxu0 %v759_v35  ;;  %1045 = vmatpush.msrb.mxu2 %v828_v39 }
 0x6f0   :  { %1046 = vmatpush.msrb.mxu2 %v825_v37 }
 0x6f3   :  { %v851_v40 = vpop.f32.mrf.mxu2 }
 0x6f4   :  { %873 = vmatmul.f32.gmra.mxu3 %v736_v33  ;;  %1016 = vmatpush.msra.mxu1 %v851_v40 }
 0x6f6   :  { %1017 = vmatpush.msra.mxu1 %v848_v38 }
 0x763   :  { %v942_v41 = vpop.f32.mrf.mxu0 }
 0x764   :  { %v943_v42 = vadd.f32 %v942_v41, %v1603_v45 }
 0x766   :  { %v948_v43 = vsel %vm297_vm3, %v943_v42, -inf }
 0x767   :  { %949 = vmax.xlane.f32.xlu2 %v948_v43 }
 0x76b   :  { %v945_v48 = vpop.f32.mrf.mxu0 }
 0x76c   :  { %v946_v49 = vadd.f32 %v945_v48, %v1611_v51 }
 0x76e   :  { %v951_v53 = vsel %vm297_vm3, %v946_v49, -inf }
 0x76f   :  { %v871_v44 = vpop.f32.mrf.mxu3 }
 0x770   :  { %v872_v46 = vadd.f32 %v871_v44, %v1603_v45 }
 0x772   :  { %v877_v47 = vsel %vm297_vm3, %v872_v46, -inf }
 0x773   :  { %878 = vmax.xlane.f32.xlu1 %v877_v47 }
 0x777   :  { %v874_v50 = vpop.f32.mrf.mxu3 }
 0x778   :  { %v875_v52 = vadd.f32 %v874_v50, %v1611_v51 }
 0x77a   :  { %v880_v54 = vsel %vm297_vm3, %v875_v52, -inf }
 0x77b   :  { %952 = vmax.xlane.f32.xlu1 %v951_v53  ;;  %881 = vmax.xlane.f32.xlu0 %v880_v54 }
 0x7da   :  { %v950_v55 = vpop.xlane.xlu2 %949 }
 0x7db   :  { %v954_v56 = vsub.f32 %v943_v42, %v950_v55 }
 0x7dd   :  { %v956_v57 = vmul.f32 1.442695, %v954_v56 }
 0x7df   :  { %1396 = vpow2.f32 %v956_v57 }
 0x7e5   :  { %v1397_v45 = vpop.eup %1396 }
 0x7e6   :  { %v879_v58 = vpop.xlane.xlu1 %878  ;;  %v960_v59 = vsel %vm297_vm3, %v1397_v45, 0.0 }
 0x7e7   :  { %v883_v60 = vsub.f32 %v872_v46, %v879_v58  ;;  %961 = vadd.xlane.f32.xlu0 %v960_v59 }
 0x7e9   :  { %v885_v61 = vmul.f32 1.442695, %v883_v60 }
 0x7eb   :  { %1398 = vpow2.f32 %v885_v61  ;;  %v1363_v61 = vld [vmem:[%s1870_s5 + $0x1] ss:$0 sm:$0xff] }
 0x7ee   :  { %v953_v62 = vpop.xlane.xlu1 %952  ;;  %v882_v51 = vpop.xlane.xlu0 %881 }
 0x7ef   :  { %v955_v63 = vsub.f32 %v946_v49, %v953_v62  ;;  %v884_v0 = vsub.f32 %v875_v52, %v882_v51 }
 0x7f1   :  { %v1399_v1 = vpop.eup %1398  ;;  %v958_v2 = vmul.f32 1.442695, %v955_v63  ;;  %v887_v3 = vmul.f32 1.442695, %v884_v0 }
 0x7f2   :  { %v889_v4 = vsel %vm297_vm3, %v1399_v1, 0.0 }
 0x7f3   :  { %1400 = vpow2.f32 %v958_v2  ;;  %890 = vadd.xlane.f32.xlu2 %v889_v4 }
 0x7f4   :  { %1402 = vpow2.f32 %v887_v3 }
 0x7f9   :  { %v1767_v5 = vpop.eup %1400 }
 0x7fa   :  { %v1769_v6 = vpop.eup %1402  ;;  %v963_v7 = vsel %vm297_vm3, %v1767_v5, 0.0 }
 0x7fb   :  { %964 = vadd.xlane.f32.xlu2 %v963_v7  ;;  %v892_v8 = vsel %vm297_vm3, %v1769_v6, 0.0 }
 0x7fc   :  { %893 = vadd.xlane.f32.xlu1 %v892_v8 }
 0x85a   :  { %v962_v9 = vpop.xlane.xlu0 %961 }
 0x85b   :  { %1404 = vrcp.f32 %v962_v9  ;;  %v977_v14 = vand.u32 2147483648, %v962_v9  ;;  %v975_v15 = vand.u32 2147483647, %v962_v9  ;;  %vm971_vm7 = vweird.f32 %v962_v9 }
 0x85d   :  { %v978_v18 = vor.u32 1.1754944e-38, %v977_v14  ;;  %vm976_vm9 = vcmp.eq.f32.partialorder %v975_v15, 8.507059e+37 }
 0x861   :  { %v1405_v10 = vpop.eup %1404 }
 0x862   :  { %v967_v11 = vmul.f32 %v1405_v10, %v962_v9  ;;  %vm972_vm6 = vweird.f32 %v1405_v10 }
 0x863   :  { %vm973_vm8 = vmor %vm971_vm7, %vm972_vm6 }
 0x864   :  { %v968_v12 = vsub.f32 1.0, %v967_v11 }
 0x866   :  { %v969_v13 = vmul.f32 %v1405_v10, %v968_v12  ;;  %v891_v16 = vpop.xlane.xlu2 %890 }
 0x867   :  { %1406 = vrcp.f32 %v891_v16  ;;  %v906_v28 = vand.u32 2147483648, %v891_v16  ;;  %v904_v31 = vand.u32 2147483647, %v891_v16  ;;  %vm900_vm11 = vweird.f32 %v891_v16 }
 0x868   :  { %v970_v17 = vadd.f32 %v1405_v10, %v969_v13 }
 0x869   :  { %v907_v35 = vor.u32 1.1754944e-38, %v906_v28  ;;  %vm905_vm14 = vcmp.eq.f32.partialorder %v904_v31, 8.507059e+37  ;;  %v1339_v31 = vld [vmem:[%s1875_s10 + $0x60] sm:$0xff] }
 0x86a   :  { %v974_v19 = vsel %vm973_vm8, %v1405_v10, %v970_v17 }
 0x86b   :  { %v979_v20 = vsel %vm976_vm9, %v978_v18, %v974_v19  ;;  %v1330_v18 = vld [vmem:[%s1873_s8 + $0x30] sm:$0xff]  ;;  %v1329_v19 = vld [vmem:[%s1873_s8 + $0x28] sm:$0xff] }
 0x86c   :  { %v980_v21 = vmul.f32 %v1397_v45, %v979_v20  ;;  %v1328_v20 = vld [vmem:[%s1873_s8 + $0x20] sm:$0xff] }
 0x86d   :  { %v1407_v23 = vpop.eup %1406 }
 0x86e   :  { %v896_v24 = vmul.f32 %v1407_v23, %v891_v16  ;;  %v965_v25 = vpop.xlane.xlu2 %964  ;;  %1321 = vmatmul.msk.f32.vlgmr.msra.gmra.mxu1 %vm297_vm3, %v980_v21  ;;  %vm901_vm10 = vweird.f32 %v1407_v23 }
 0x86f   :  { %1408 = vrcp.f32 %v965_v25  ;;  %v894_v32 = vpop.xlane.xlu1 %893  ;;  %vm902_vm12 = vmor %vm900_vm11, %vm901_vm10  ;;  %v992_v43 = vand.u32 2147483648, %v965_v25  ;;  %v990_v48 = vand.u32 2147483647, %v965_v25  ;;  %vm986_vm1 = vweird.f32 %v965_v25 }
 0x870   :  { %v897_v27 = vsub.f32 1.0, %v896_v24  ;;  %1410 = vrcp.f32 %v894_v32  ;;  %v921_v47 = vand.u32 2147483648, %v894_v32  ;;  %v919_v50 = vand.u32 2147483647, %v894_v32 }
 0x871   :  { %v993_v53 = vor.u32 1.1754944e-38, %v992_v43  ;;  %vm915_vm4 = vweird.f32 %v894_v32  ;;  %vm991_vm6 = vcmp.eq.f32.partialorder %v990_v48, 8.507059e+37  ;;  %v1365_v48 = vld [vmem:[%s1872_s7 + $0x1] ss:$0 sm:$0xff] }
 0x872   :  { %v898_v30 = vmul.f32 %v1407_v23, %v897_v27  ;;  %v922_v55 = vor.u32 1.1754944e-38, %v921_v47  ;;  %vm920_vm8 = vcmp.eq.f32.partialorder %v919_v50, 8.507059e+37  ;;  %v1340_v27 = vld [vmem:[%s1875_s10 + $0x68] sm:$0xff] }
 0x874   :  { %v899_v33 = vadd.f32 %v1407_v23, %v898_v30 }
 0x875   :  { %v1409_v34 = vpop.eup %1408 }
 0x876   :  { %v1411_v36 = vpop.eup %1410  ;;  %v903_v37 = vsel %vm902_vm12, %v1407_v23, %v899_v33  ;;  %v982_v38 = vmul.f32 %v1409_v34, %v965_v25  ;;  %vm987_vm15 = vweird.f32 %v1409_v34  ;;  %v1342_v25 = vld [vmem:[%s1875_s10 + $0x78] sm:$0xff] }
 0x877   :  { %v908_v39 = vsel %vm905_vm14, %v907_v35, %v903_v37  ;;  %v911_v40 = vmul.f32 %v1411_v36, %v894_v32  ;;  %vm916_vm0 = vweird.f32 %v1411_v36  ;;  %vm988_vm5 = vmor %vm986_vm1, %vm987_vm15  ;;  %v1341_v32 = vld [vmem:[%s1875_s10 + $0x70] sm:$0xff]  ;;  %1190 = vmatpush.msra.mxu0 %v1342_v25 }
 0x878   :  { %v983_v41 = vsub.f32 1.0, %v982_v38  ;;  %v909_v42 = vmul.f32 %v1399_v1, %v908_v39  ;;  %vm917_vm7 = vmor %vm915_vm4, %vm916_vm0 }
 0x879   :  { %v912_v44 = vsub.f32 1.0, %v911_v40  ;;  %1191 = vmatpush.msra.mxu0 %v1341_v32 }
 0x87a   :  { %v984_v46 = vmul.f32 %v1409_v34, %v983_v41  ;;  %1323 = vmatmul.msk.f32.vlgmr.msrb.gmra.mxu2 %vm297_vm3, %v909_v42  ;;  %v1364_v42 = vld [vmem:[%s1871_s6 + $0x1] ss:$0 sm:$0xff] }
 0x87b   :  { %v913_v49 = vmul.f32 %v1411_v36, %v912_v44  ;;  %1192 = vmatpush.msra.mxu0 %v1340_v27 }
 0x87c   :  { %v985_v52 = vadd.f32 %v1409_v34, %v984_v46 }
 0x87d   :  { %v914_v54 = vadd.f32 %v1411_v36, %v913_v49  ;;  %1193 = vmatpush.msra.mxu0 %v1339_v31 }
 0x87e   :  { %v989_v56 = vsel %vm988_vm5, %v1409_v34, %v985_v52 }
 0x87f   :  { %v994_v57 = vsel %vm991_vm6, %v993_v53, %v989_v56  ;;  %v918_v45 = vsel %vm917_vm7, %v1411_v36, %v914_v54  ;;  %v1338_v36 = vld [vmem:[%s1875_s10 + $0x58] sm:$0xff] }
 0x880   :  { %v995_v58 = vmul.f32 %v1767_v5, %v994_v57  ;;  %v923_v59 = vsel %vm920_vm8, %v922_v55, %v918_v45  ;;  %1194 = vmatpush.msra.mxu0 %v1338_v36  ;;  %v1368_v36 = vld [vmem:[%s1877_s12 + $0x1] ss:$0 sm:$0xff]  ;;  %s1476_s12 = smov [#allocation5]  }
 0x881   :  { %v924_v60 = vmul.f32 %v1769_v6, %v923_v59  ;;  %v1336_v59 = vld [vmem:[%s1875_s10 + $0x48] sm:$0xff]  ;;  %s1271_s18 = sshll.u32 %s1476_s12, 4  ;;  %s1272_s18 = int_to_ptr.vmem [resolvable:$true] %s1271_s18 }
 0x882   :  { %1322 = vmatmul.msk.f32.gmra.mxu1 %vm297_vm3, %v995_v58  ;;  %v1337_v58 = vld [vmem:[%s1875_s10 + $0x50] sm:$0xff] }
 0x883   :  { %1324 = vmatmul.msk.f32.gmra.mxu2 %vm297_vm3, %v924_v60  ;;  %1195 = vmatpush.msra.mxu0 %v1337_v58  ;;  %v1335_v60 = vld [vmem:[%s1875_s10 + $0x40] sm:$0xff] }
 0x885   :  { %1196 = vmatpush.msra.mxu0 %v1336_v59 }
 0x887   :  { %1197 = vmatpush.msra.mxu0 %v1335_v60 }
 0x8eb   :  { %v1019_v62 = vpop.f32.mrf.mxu1 }
 0x8fd   :  { %v1048_v51 = vpop.f32.mrf.mxu2 }
 0x8fe   :  { %v1049_v63 = vadd.f32 %v1048_v51, %v1019_v62 }
 0x8ff   :  { %v1022_v3 = vpop.f32.mrf.mxu1 }
 0x900   :  { %v1059_v0 = vadd.f32 %v1363_v61, %v1049_v63 }
 0x902   :  { %v1061_v1 = vadd.f32 %v1059_v0, %v1728_v22 }
 0x904   :  { %v1067_v2 = vsel %vm129_vm2, %v1061_v1, 0.0 }
 0x905   :  { %1068 = vadd.xlane.f32.xlu0 %v1067_v2 }
 0x906   :  { %v1051_v4 = vpop.f32.mrf.mxu2 }
 0x907   :  { %v1052_v5 = vadd.f32 %v1051_v4, %v1022_v3  ;;  %v1367_v3 = vld [vmem:[%s1876_s11 + $0x1] ss:$0 sm:$0xff] }
 0x909   :  { %v1060_v6 = vadd.f32 %v1363_v61, %v1052_v5  ;;  %v1366_v61 = vld [vmem:[%s1874_s9 + $0x1] ss:$0 sm:$0xff] }
 0x90b   :  { %v1062_v7 = vadd.f32 %v1060_v6, %v1739_v26  ;;  %v1331_v26 = vld [vmem:[%s1873_s8 + $0x38] sm:$0xff] }
 0x90c   :  { %1149 = vmatpush.msrb.mxu3 %v1331_v26 }
 0x90d   :  { %v1070_v8 = vsel %vm129_vm2, %v1062_v7, 0.0 }
 0x90e   :  { %1071 = vadd.xlane.f32.xlu1 %v1070_v8  ;;  %1150 = vmatpush.msrb.mxu3 %v1330_v18 }
 0x910   :  { %1151 = vmatpush.msrb.mxu3 %v1329_v19 }
 0x912   :  { %1152 = vmatpush.msrb.mxu3 %v1328_v20 }
 0x978   :  { %v1069_v9 = vpop.xlane.xlu0 %1068 }
 0x979   :  { %v1073_v10 = vmul.f32 %v1069_v9, %v1645_v29 }
 0x97b   :  { %v1075_v11 = vsub.f32 %v1061_v1, %v1073_v10 }
 0x97d   :  { %v1077_v12 = vmul.f32 %v1075_v11, %v1075_v11 }
 0x97f   :  { %v1079_v14 = vsel %vm129_vm2, %v1077_v12, 0.0 }
 0x980   :  { %1080 = vadd.xlane.f32.xlu2 %v1079_v14 }
 0x981   :  { %v1072_v22 = vpop.xlane.xlu1 %1071 }
 0x982   :  { %v1074_v13 = vmul.f32 %v1072_v22, %v1645_v29 }
 0x984   :  { %v1076_v15 = vsub.f32 %v1062_v7, %v1074_v13 }
 0x986   :  { %v1078_v16 = vmul.f32 %v1076_v15, %v1076_v15 }
 0x988   :  { %v1082_v17 = vsel %vm129_vm2, %v1078_v16, 0.0 }
 0x989   :  { %1083 = vadd.xlane.f32.xlu0 %v1082_v17 }
 0x9f3   :  { %v1081_v21 = vpop.xlane.xlu2 %1080 }
 0x9f4   :  { %v1085_v23 = vmul.f32 %v1081_v21, %v1645_v29 }
 0x9f6   :  { %v1087_v24 = vadd.f32 1e-05, %v1085_v23 }
 0x9f8   :  { %1412 = vrsqrt.f32 %v1087_v24  ;;  %vm1095_vm9 = vweird.f32 %v1087_v24 }
 0x9fc   :  { %v1084_v28 = vpop.xlane.xlu0 %1083 }
 0x9fd   :  { %v1086_v30 = vmul.f32 %v1084_v28, %v1645_v29 }
 0x9fe   :  { %v1413_v33 = vpop.eup %1412 }
 0x9ff   :  { %v1090_v34 = vmul.f32 %v1413_v33, %v1087_v24  ;;  %v1088_v35 = vadd.f32 1e-05, %v1086_v30  ;;  %vm1096_vm3 = vweird.f32 %v1413_v33 }
 0xa00   :  { %vm1097_vm10 = vmor %vm1095_vm9, %vm1096_vm3 }
 0xa01   :  { %v1091_v37 = vmul.f32 %v1413_v33, %v1090_v34  ;;  %1414 = vrsqrt.f32 %v1088_v35  ;;  %vm1105_vm12 = vweird.f32 %v1088_v35 }
 0xa03   :  { %v1092_v38 = vmul.f32 0.5, %v1091_v37 }
 0xa05   :  { %v1093_v39 = vsub.f32 1.5, %v1092_v38 }
 0xa07   :  { %v1415_v40 = vpop.eup %1414  ;;  %v1094_v41 = vmul.f32 %v1413_v33, %v1093_v39 }
 0xa08   :  { %v1100_v43 = vmul.f32 %v1415_v40, %v1088_v35  ;;  %vm1106_vm11 = vweird.f32 %v1415_v40 }
 0xa09   :  { %v1098_v44 = vsel %vm1097_vm10, %v1413_v33, %v1094_v41  ;;  %vm1107_vm14 = vmor %vm1105_vm12, %vm1106_vm11 }
 0xa0a   :  { %v1109_v46 = vmul.f32 %v1098_v44, %v1075_v11  ;;  %v1101_v47 = vmul.f32 %v1415_v40, %v1100_v43 }
 0xa0c   :  { %v1114_v49 = vmul.f32 %v1364_v42, %v1109_v46  ;;  %v1102_v50 = vmul.f32 0.5, %v1101_v47 }
 0xa0e   :  { %v1103_v52 = vsub.f32 1.5, %v1102_v50  ;;  %v1119_v53 = vadd.f32 %v1365_v48, %v1114_v49 }
 0xa10   :  { %v1104_v54 = vmul.f32 %v1415_v40, %v1103_v52  ;;  %1333 = vmatmul.msk.f32.vlgmr.msrb.gmra.mxu3 %vm129_vm2, %v1119_v53 }
 0xa12   :  { %v1108_v55 = vsel %vm1107_vm14, %v1415_v40, %v1104_v54 }
 0xa13   :  { %v1110_v56 = vmul.f32 %v1108_v55, %v1076_v15 }
 0xa15   :  { %v1115_v57 = vmul.f32 %v1364_v42, %v1110_v56 }
 0xa17   :  { %v1120_v45 = vadd.f32 %v1365_v48, %v1115_v57 }
 0xa19   :  { %1334 = vmatmul.msk.f32.gmra.mxu3 %vm129_vm2, %v1120_v45 }
 0xa93   :  { %v1154_v62 = vpop.f32.mrf.mxu3 }
 0xa94   :  { %v1155_v51 = vadd.f32 %v1366_v61, %v1154_v62 }
 0xa96   :  { %v1160_v63 = vmax.f32 %v1155_v51, 0.0 }
 0xa98   :  { %1344 = vmatmul.msk.f32.vlgmr.msra.gmra.mxu0 %vm597_vm13, %v1160_v63 }
 0xa9c   :  { %v1157_v0 = vpop.f32.mrf.mxu3 }
 0xa9d   :  { %v1158_v1 = vadd.f32 %v1366_v61, %v1157_v0 }
 0xa9f   :  { %v1161_v2 = vmax.f32 %v1158_v1, 0.0 }
 0xaa1   :  { %1345 = vmatmul.msk.f32.gmra.mxu0 %vm597_vm13, %v1161_v2 }
 0xb15   :  { %v1199_v4 = vpop.f32.mrf.mxu0 }
 0xb16   :  { %v1200_v5 = vadd.f32 %v1367_v3, %v1199_v4 }
 0xb18   :  { %v1205_v6 = vadd.f32 %v1200_v5, %v1119_v53 }
 0xb1a   :  { %v1211_v7 = vsel %vm129_vm2, %v1205_v6, 0.0 }
 0xb1b   :  { %1212 = vadd.xlane.f32.xlu1 %v1211_v7 }
 0xb1e   :  { %v1202_v8 = vpop.f32.mrf.mxu0 }
 0xb1f   :  { %v1203_v9 = vadd.f32 %v1367_v3, %v1202_v8 }
 0xb21   :  { %v1206_v10 = vadd.f32 %v1203_v9, %v1120_v45 }
 0xb23   :  { %v1214_v11 = vsel %vm129_vm2, %v1206_v10, 0.0 }
 0xb24   :  { %1215 = vadd.xlane.f32.xlu2 %v1214_v11 }
 0xb8e   :  { %v1213_v12 = vpop.xlane.xlu1 %1212 }
 0xb8f   :  { %v1217_v14 = vmul.f32 %v1213_v12, %v1645_v29 }
 0xb91   :  { %v1219_v22 = vsub.f32 %v1205_v6, %v1217_v14 }
 0xb93   :  { %v1221_v13 = vmul.f32 %v1219_v22, %v1219_v22 }
 0xb95   :  { %v1223_v15 = vsel %vm129_vm2, %v1221_v13, 0.0 }
 0xb96   :  { %1224 = vadd.xlane.f32.xlu0 %v1223_v15 }
 0xb97   :  { %v1216_v16 = vpop.xlane.xlu2 %1215 }
 0xb98   :  { %v1218_v17 = vmul.f32 %v1216_v16, %v1645_v29 }
 0xb9a   :  { %v1220_v26 = vsub.f32 %v1206_v10, %v1218_v17 }
 0xb9c   :  { %v1222_v18 = vmul.f32 %v1220_v26, %v1220_v26 }
 0xb9e   :  { %v1226_v19 = vsel %vm129_vm2, %v1222_v18, 0.0 }
 0xb9f   :  { %1227 = vadd.xlane.f32.xlu1 %v1226_v19 }
 0xc09   :  { %v1225_v20 = vpop.xlane.xlu0 %1224 }
 0xc0a   :  { %v1229_v21 = vmul.f32 %v1225_v20, %v1645_v29 }
 0xc0c   :  { %v1231_v23 = vadd.f32 1e-05, %v1229_v21 }
 0xc0e   :  { %1416 = vrsqrt.f32 %v1231_v23  ;;  %vm1239_vm15 = vweird.f32 %v1231_v23 }
 0xc12   :  { %v1228_v24 = vpop.xlane.xlu1 %1227 }
 0xc13   :  { %v1230_v25 = vmul.f32 %v1228_v24, %v1645_v29  ;;  %v1369_v29 = vld [vmem:[%s1878_s13 + $0x1] ss:$0 sm:$0xff]  ;;  %s1273_s13 = sshll.u32 %s1879_s14, 4  ;;  %s1274_s13 = int_to_ptr.hbm [resolvable:$true] %s1273_s13 }
 0xc14   :  { %v1417_v32 = vpop.eup %1416 }
 0xc15   :  { %v1234_v27 = vmul.f32 %v1417_v32, %v1231_v23  ;;  %v1232_v28 = vadd.f32 1e-05, %v1230_v25  ;;  %vm1240_vm13 = vweird.f32 %v1417_v32 }
 0xc16   :  { %vm1241_vm0 = vmor %vm1239_vm15, %vm1240_vm13 }
 0xc17   :  { %v1235_v30 = vmul.f32 %v1417_v32, %v1234_v27  ;;  %1418 = vrsqrt.f32 %v1232_v28  ;;  %vm1249_vm4 = vweird.f32 %v1232_v28 }
 0xc19   :  { %v1236_v31 = vmul.f32 0.5, %v1235_v30 }
 0xc1b   :  { %v1237_v33 = vsub.f32 1.5, %v1236_v31 }
 0xc1d   :  { %v1419_v34 = vpop.eup %1418  ;;  %v1238_v35 = vmul.f32 %v1417_v32, %v1237_v33 }
 0xc1e   :  { %v1244_v37 = vmul.f32 %v1419_v34, %v1232_v28  ;;  %vm1250_vm1 = vweird.f32 %v1419_v34 }
 0xc1f   :  { %v1242_v38 = vsel %vm1241_vm0, %v1417_v32, %v1238_v35  ;;  %vm1251_vm5 = vmor %vm1249_vm4, %vm1250_vm1 }
 0xc20   :  { %v1253_v39 = vmul.f32 %v1242_v38, %v1219_v22  ;;  %v1245_v40 = vmul.f32 %v1419_v34, %v1244_v37 }
 0xc22   :  { %v1258_v41 = vmul.f32 %v1368_v36, %v1253_v39  ;;  %v1246_v42 = vmul.f32 0.5, %v1245_v40 }
 0xc24   :  { %v1263_v43 = vadd.f32 %v1369_v29, %v1258_v41  ;;  %v1247_v44 = vsub.f32 1.5, %v1246_v42 }
 0xc26   :  { %1265 = vst.msk [vmem:[#allocation5] sm:$0xff] %vm129_vm2, %v1263_v43  ;;  %v1248_v46 = vmul.f32 %v1419_v34, %v1247_v44 }
 0xc28   :  { %v1252_v47 = vsel %vm1251_vm5, %v1419_v34, %v1248_v46 }
 0xc29   :  { %v1254_v48 = vmul.f32 %v1252_v47, %v1220_v26 }
 0xc2b   :  { %v1259_v49 = vmul.f32 %v1368_v36, %v1254_v48 }
 0xc2d   :  { %v1264_v50 = vadd.f32 %v1369_v29, %v1259_v49 }
 0xc2f   :  { %1266 = vst.msk [vmem:[#allocation5 + $0x8] sm:$0xff] %vm129_vm2, %v1264_v50 }
 0xc30   :  { %1279 = dma.vmem_to_hbm [thread:$0]  %s1272_s18, 256, %s1274_s13, [#allocation4], %s1477_s21, %s1477_s21, %s1478_s22  }
 0xc31   :  { %1470 = dma.done.wait [#allocation4], 256  }
 0xc32   :  { %1471 = vsyncadd [#allocation4], 4294967040 }
 0xc33   :  { %1284 = vsyncpa [#allocation3], 1 }
 0xc34   :  { %1285 = vsyncpa [#allocation4], 1 }

</bundles_post_ra>
